<compile_context>
chip_gen: v5e
topology: v5e:2x2
jax: 0.10.0
libtpu: 0.0.40
codegen_flags: <defaults>
</compile_context>

<pallas_src>
import functools

import jax
import jax.numpy as jnp
from jax.experimental import pallas as pl
from jax.experimental.pallas import tpu as pltpu


# ---------------------------------------------------------------------------
# Per-generation scoped-VMEM budget
#   v7x : 64 MiB physical  -> ~32 MiB scoped limit
#   v5e/v6e : 128 MiB physical -> ~64 MiB scoped limit
# ---------------------------------------------------------------------------
def _vmem_limit_bytes():
    cap = 64 * 1024 * 1024                      # conservative default (v7x physical)
    try:
        info = pltpu.get_tpu_info()
        c = getattr(info, "vmem_capacity_bytes", None)
        if c:
            cap = int(c)
    except Exception:
        pass
    return int(min(cap // 2, 96 * 1024 * 1024))


def _aligned_divisors(n, align=128):
    """Divisors of n that are multiples of `align`, plus n itself, descending."""
    cands = {n}
    d = (n // align) * align
    while d >= align:
        if n % d == 0:
            cands.add(d)
        d -= align
    return sorted(cands, reverse=True)


def _pick_heads_tiles(B, F, S, dim, feats_itemsize, vmem_limit):
    """Byte-budget-driven (tb, ts): make the feats block as large as the scoped
    VMEM allows (2*feats + 2*weights + 2*out + acc <= ~0.85*limit).  For ViCC
    shapes this collapses the S grid to a single step per (view, batch-tile)."""
    w_bytes = 2 * ((F * F + F * dim) * 2 + (F + dim) * 4)   # double-buffered head params
    budget = int(vmem_limit * 0.85) - w_bytes

    def fits(tb_, ts_):
        feats = 2 * tb_ * F * ts_ * feats_itemsize          # double-buffered feats stream
        out = 2 * tb_ * dim * 4                              # double-buffered output
        acc = tb_ * F * 4                                    # pooled-sum accumulator
        return feats + out + acc <= budget

    tb_cands = [B] + [t for t in (512, 256, 128, 64, 32, 16, 8)
                      if t < B and B % t == 0]
    ts_cands = _aligned_divisors(S)
    for tb in tb_cands:
        for ts in ts_cands:
            if fits(tb, ts):
                return tb, ts
    return tb_cands[-1], ts_cands[-1]


def _pick_queue_tile(B, dim, K_pad, vmem_limit):
    """Largest 128-aligned K tile that fits VMEM; the whole queue stays resident
    whenever possible (grid=(1,) -> no per-step grid overhead)."""
    budget = int(vmem_limit * 0.85) - 2 * 2 * B * dim * 4    # resident qk (double-buffered)
    for tk in _aligned_divisors(K_pad):
        if 2 * dim * tk * 2 + 2 * B * tk * 4 <= budget:      # queue (bf16) + lneg out (f32)
            return tk
    return 128


# ---------------------------------------------------------------------------
# Kernel 1: fused projection heads (both views) with streamed avg-pool over S
# ---------------------------------------------------------------------------
def _heads_kernel(feats_ref, w1_ref, b1_ref, w2_ref, b2_ref, out_ref, acc_ref,
                  *, inv_s):
    s_idx = pl.program_id(2)

    @pl.when(s_idx == 0)
    def _init():
        acc_ref[...] = jnp.zeros_like(acc_ref)

    # AdaptiveAvgPool3d((1,1,1)): accumulate the (T,H,W) sum in f32.
    # Byte-budget tiling gives ts == S for all realistic ViCC shapes, so this
    # reduce runs once per (view, batch-tile) and the kernel stays DMA-bound
    # (no per-step XLU work in a hot loop).
    acc_ref[...] += jnp.sum(feats_ref[...].astype(jnp.float32), axis=-1)

    @pl.when(s_idx == pl.num_programs(2) - 1)
    def _finalize():
        pooled = acc_ref[...] * inv_s                                    # [tb, F] f32
        # 1x1x1 Conv3d (+bias) == linear; bf16 MXU operands, f32 accumulation.
        h = jnp.dot(pooled.astype(w1_ref.dtype), w1_ref[...],
                    preferred_element_type=jnp.float32) + b1_ref[...]    # [tb, F]
        h = jnp.maximum(h, 0.0)                                           # ReLU
        q = jnp.dot(h.astype(w2_ref.dtype), w2_ref[...],
                    preferred_element_type=jnp.float32) + b2_ref[...]     # [tb, dim]
        # F.normalize(dim=1) == q / max(||q||, 1e-12), via rsqrt on the EUP.
        sumsq = jnp.sum(q * q, axis=-1, keepdims=True)
        out_ref[...] = (q * jax.lax.rsqrt(jnp.maximum(sumsq, 1e-24))
                        ).astype(out_ref.dtype)


def projection_heads(block, params_q, params_k, *, ts=None, tb=None,
                     vmem_limit=None):
    """Both views' projection heads in one pallas_call.

    block:    [B, 2, F, S]  backbone feature maps; the view is selected via
                            BlockSpec (no wrapper slicing -> no HBM copies).
    returns:  qk [2, B, dim] L2-normalized embeddings
              (index 0 -> encoder_q head, index 1 -> second/key encoder head).
    """
    B, n_views, F, S = block.shape
    assert n_views == 2
    dim = params_q[2].shape[-1]
    vmem_limit = _vmem_limit_bytes() if vmem_limit is None else vmem_limit

    auto_tb, auto_ts = _pick_heads_tiles(B, F, S, dim,
                                         jnp.dtype(block.dtype).itemsize,
                                         vmem_limit)
    tb = auto_tb if tb is None else tb
    ts = auto_ts if ts is None else ts
    assert S % ts == 0, (S, ts)
    assert B % tb == 0, (B, tb)

    # Stack the two encoders' head params along a leading view axis so the view
    # grid axis indexes the right weights (tiny arrays, one-time cost).
    w1s = jnp.stack([params_q[0], params_k[0]])      # [2, F, F]   bf16
    b1s = jnp.stack([params_q[1], params_k[1]])      # [2, 1, F]   f32
    w2s = jnp.stack([params_q[2], params_k[2]])      # [2, F, dim] bf16
    b2s = jnp.stack([params_q[3], params_k[3]])      # [2, 1, dim] f32

    grid = (2, B // tb, S // ts)   # (view, batch tile, S tile) - reduction axis last

    return pl.pallas_call(
        functools.partial(_heads_kernel, inv_s=1.0 / S),
        grid=grid,
        in_specs=[
            # view dim squeezed out; the view grid axis picks block[:, c]
            pl.BlockSpec((tb, None, F, ts), lambda c, b, s: (b, c, 0, s)),
            pl.BlockSpec((None, F, F),      lambda c, b, s: (c, 0, 0)),
            pl.BlockSpec((None, 1, F),      lambda c, b, s: (c, 0, 0)),
            pl.BlockSpec((None, F, dim),    lambda c, b, s: (c, 0, 0)),
            pl.BlockSpec((None, 1, dim),    lambda c, b, s: (c, 0, 0)),
        ],
        out_specs=pl.BlockSpec((None, tb, dim), lambda c, b, s: (c, b, 0)),
        out_shape=jax.ShapeDtypeStruct((2, B, dim), jnp.float32),
        scratch_shapes=[pltpu.VMEM((tb, F), jnp.float32)],   # pooled-sum accumulator
        compiler_params=pltpu.CompilerParams(
            # view & batch tiles are independent (shard across v7x's 2 TCs);
            # the S axis is the pooling reduction -> "arbitrary", kept last.
            dimension_semantics=("parallel", "parallel", "arbitrary"),
            vmem_limit_bytes=vmem_limit,
        ),
    )(block, w1s, b1s, w2s, b2s)


# ---------------------------------------------------------------------------
# Kernel 2: negative logits q @ queue (queue VMEM-resident when it fits)
# ---------------------------------------------------------------------------
def _logits_kernel(q_ref, queue_ref, lneg_ref, *, inv_t):
    # Fold 1/T into q ([B, dim] VPU work).  tk is sized so the grid is a single
    # step for ViCC-scale queues, so this scale+cast is not re-done per tile.
    q = q_ref[...] * inv_t                                                # [B, dim] f32
    lneg_ref[...] = jnp.dot(q.astype(queue_ref.dtype), queue_ref[...],
                            preferred_element_type=jnp.float32
                            ).astype(lneg_ref.dtype)


def negative_logits(qk, queue, temperature, *, tk=None, vmem_limit=None):
    """l_neg = (q / T) @ queue with the whole queue resident when it fits."""
    n_views, B, dim = qk.shape
    assert n_views == 2
    dim_q, K = queue.shape
    assert dim_q == dim
    vmem_limit = _vmem_limit_bytes() if vmem_limit is None else vmem_limit

    # Pad K to a 128-lane multiple (zero columns, sliced off below) so the
    # output stores stay unmasked lane-dense for any K.
    K_pad = ((K + 127) // 128) * 128
    if K_pad != K:
        queue = jnp.pad(queue, ((0, 0), (0, K_pad - K)))

    tk = _pick_queue_tile(B, dim, K_pad, vmem_limit) if tk is None else tk
    assert K_pad % tk == 0, (K_pad, tk)

    lneg = pl.pallas_call(
        functools.partial(_logits_kernel, inv_t=1.0 / temperature),
        grid=(K_pad // tk,),
        in_specs=[
            pl.BlockSpec((None, B, dim), lambda j: (0, 0, 0)),  # q (view 0) VMEM-resident
            pl.BlockSpec((dim, tk),      lambda j: (0, j)),     # queue K-tile
        ],
        out_specs=pl.BlockSpec((B, tk), lambda j: (0, j)),
        out_shape=jax.ShapeDtypeStruct((B, K_pad), jnp.float32),
        compiler_params=pltpu.CompilerParams(
            # No revisited output block (l_pos lives in the wrapper), so the
            # K-tile axis can shard across v7x's two TensorCores.
            dimension_semantics=("parallel",),
            vmem_limit_bytes=vmem_limit,
        ),
    )(qk, queue)
    return lneg[:, :K]


# ---------------------------------------------------------------------------
# Forward wrapper
# ---------------------------------------------------------------------------
def vicc_forward(block, params_q, params_k, queue, temperature=0.07,
                 *, ts=None, tb=None, tk=None):
    """block: [B, 2, F, S] backbone feature maps for the two views."""
    B = block.shape[0]
    qk = projection_heads(block, params_q, params_k, ts=ts, tb=tb)    # [2, B, dim] f32
    # key path: shuffle/unshuffle + all_gather are identity at world_size=1
    # l_pos: row-wise q.k of two [B, dim] vectors -- trivial VPU work in the
    # wrapper so the streamed l_neg kernel has no revisited output block.
    l_pos = jnp.sum(qk[0] * qk[1], axis=-1, keepdims=True) * (1.0 / temperature)
    l_neg = negative_logits(qk, queue, temperature, tk=tk)            # [B, K]
    # Final concat in the JAX wrapper keeps the kernel's wide output lane-dense.
    logits = jnp.concatenate([l_pos, l_neg], axis=1)                  # [B, 1+K]
    labels = jnp.zeros((B,), dtype=jnp.int32)
    return logits, labels


# ---------------------------------------------------------------------------
# Deterministic parameter construction
# ---------------------------------------------------------------------------
def make_head_params(key, feature_size, dim):
    k1, k2, k3, k4 = jax.random.split(key, 4)
    # 1x1x1 Conv3d weights stored as [in, out] (== torch weight [out,in,1,1,1].T);
    # weights in bf16 (MXU operand / DMA format), biases in f32.
    w1 = (jax.random.normal(k1, (feature_size, feature_size), jnp.float32)
          * 0.05).astype(jnp.bfloat16)
    b1 = jax.random.normal(k2, (1, feature_size), jnp.float32) * 0.01
    w2 = (jax.random.normal(k3, (feature_size, dim), jnp.float32)
          * 0.05).astype(jnp.bfloat16)
    b2 = jax.random.normal(k4, (1, dim), jnp.float32) * 0.01
    return (w1, b1, w2, b2)


def make_queue(key, dim, K):
    queue = jax.random.normal(key, (dim, K), jnp.float32)
    queue = queue / jnp.maximum(
        jnp.sqrt(jnp.sum(queue * queue, axis=0, keepdims=True)), 1e-12)
    return queue.astype(jnp.bfloat16)   # bf16 storage halves the HBM stream


if __name__ == "__main__":
    # Small, forward-consistent shapes (real ViCC: feature_size=1024, dim=128, K=1920)
    B = 2                 # batch
    feature_size = 64     # backbone feature channels
    dim = 128             # projection dim (module default)
    K = 1920              # queue size / number of negatives (module default)
    T3, H, W = 4, 8, 8    # spatio-temporal extent of the backbone output
    S = T3 * H * W        # 256, flattened lane axis
    temperature = 0.07

    key = jax.random.PRNGKey(0)
    k_block, k_q, k_k, k_queue = jax.random.split(key, 4)
    # block: [B, 2, F, S] -- backbone feature maps for the two views, stored in
    # bf16 (the HBM-bandwidth-dominant operand).
    block = jax.random.normal(
        k_block, (B, 2, feature_size, S), jnp.float32).astype(jnp.bfloat16)

    params_q = make_head_params(k_q, feature_size, dim)   # encoder_q head
    params_k = make_head_params(k_k, feature_size, dim)   # second / key encoder head
    queue = make_queue(k_queue, dim, K)

    @jax.jit
    def fwd(blk, pq, pk, qu):
        # Tiles auto-picked by byte budget: ts collapses to S (single S step)
        # and tk collapses to the full queue (single K step).
        return vicc_forward(blk, pq, pk, qu, temperature=temperature)

    logits, labels = fwd(block, params_q, params_k, queue)
    logits = jax.block_until_ready(logits)
    labels = jax.block_until_ready(labels)

    assert logits.shape == (B, 1 + K)
    assert labels.shape == (B,)

    # Pure-JAX reference (same bf16-operand / f32-accumulate math).
    def ref_head(feats, w1, b1, w2, b2):
        pooled = jnp.mean(feats.astype(jnp.float32), axis=-1)
        h = jnp.dot(pooled.astype(jnp.bfloat16), w1,
                    preferred_element_type=jnp.float32) + b1
        h = jnp.maximum(h, 0.0)
        q = jnp.dot(h.astype(jnp.bfloat16), w2,
                    preferred_element_type=jnp.float32) + b2
        return q / jnp.maximum(jnp.linalg.norm(q, axis=-1, keepdims=True), 1e-12)

    q_ref = ref_head(block[:, 0], *params_q)
    k_ref = ref_head(block[:, 1], *params_k)
    qs = q_ref * (1.0 / temperature)
    l_pos_ref = jnp.sum(qs * k_ref, axis=-1, keepdims=True)
    l_neg_ref = jnp.dot(qs.astype(jnp.bfloat16), queue,
                        preferred_element_type=jnp.float32)
    logits_ref = jnp.concatenate([l_pos_ref, l_neg_ref], axis=1)

    max_err = float(jnp.max(jnp.abs(logits - logits_ref)))
    assert jnp.allclose(logits, logits_ref, atol=2e-2, rtol=2e-2), max_err
    print("KERNEL_OK")
</pallas_src>

<mosaic_0001>
module attributes {stable_mosaic.version = 11 : i64} {
  func.func @_logits_kernel(%arg0: i32, %arg1: memref<1x2x128xf32, #tpu.memory_space<vmem>>, %arg2: memref<128x1920xbf16, #tpu.memory_space<vmem>>, %arg3: memref<2x1920xf32, #tpu.memory_space<vmem>>) attributes {dimension_semantics = [#tpu.dimension_semantics<parallel>], iteration_bounds = array<i64: 1>, scalar_prefetch = 0 : i64, scratch_operands = 0 : i64, tpu.core_type = #tpu.core_type<tc>, window_params = [{transform_indices = @transform_0, window_bounds = array<i64: 1, 2, 128>}, {transform_indices = @transform_1, window_bounds = array<i64: 128, 1920>}, {transform_indices = @transform_2, window_bounds = array<i64: 2, 1920>}]} {
    %c0 = arith.constant 0 : index
    %c0_0 = arith.constant 0 : index
    %c0_1 = arith.constant 0 : index
    %0 = vector.load %arg1[%c0, %c0_0, %c0_1] : memref<1x2x128xf32, #tpu.memory_space<vmem>>, vector<1x2x128xf32>
    %1 = vector.shape_cast %0 : vector<1x2x128xf32> to vector<2x128xf32>
    %cst = arith.constant 14.2857141 : f32
    %2 = vector.broadcast %cst : f32 to vector<2x128xf32>
    %3 = arith.mulf %1, %2 : vector<2x128xf32>
    %4 = arith.truncf %3 : vector<2x128xf32> to vector<2x128xbf16>
    %c0_2 = arith.constant 0 : index
    %c0_3 = arith.constant 0 : index
    %5 = vector.load %arg2[%c0_2, %c0_3] : memref<128x1920xbf16, #tpu.memory_space<vmem>>, vector<128x1920xbf16>
    %cst_4 = arith.constant dense<0.000000e+00> : vector<2x1920xf32>
    %6 = tpu.matmul %4, %5, %cst_4 {dimension_numbers = #tpu.dot_dimension_numbers<[1], [0], [0], [1], [0, 0, 1, 1], [], []>} : vector<2x128xbf16>, vector<128x1920xbf16>, vector<2x1920xf32> -> vector<2x1920xf32>
    %c0_5 = arith.constant 0 : index
    %c0_6 = arith.constant 0 : index
    %7 = vector.load %arg3[%c0_5, %c0_6] : memref<2x1920xf32, #tpu.memory_space<vmem>>, vector<2x1920xf32>
    tpu.vector_store %arg3[%c0_5, %c0_6], %6 {strides = array<i32>} : memref<2x1920xf32, #tpu.memory_space<vmem>>, vector<2x1920xf32>,
    return
  }
  func.func @transform_0(%arg0: i32) -> (i32, i32, i32) {
    %c0_i32 = arith.constant 0 : i32
    %c0_i32_0 = arith.constant 0 : i32
    %c0_i32_1 = arith.constant 0 : i32
    %c0_i32_2 = arith.constant 0 : i32
    return %c0_i32, %c0_i32_0, %c0_i32_1 : i32, i32, i32
  }
  func.func @transform_1(%arg0: i32) -> (i32, i32) {
    %c0_i32 = arith.constant 0 : i32
    %c0_i32_0 = arith.constant 0 : i32
    return %c0_i32, %arg0 : i32, i32
  }
  func.func @transform_2(%arg0: i32) -> (i32, i32) {
    %c0_i32 = arith.constant 0 : i32
    %c0_i32_0 = arith.constant 0 : i32
    return %c0_i32, %arg0 : i32, i32
  }
}

module attributes {stable_mosaic.version = 11 : i64} {
  func.func @_heads_kernel(%arg0: i32, %arg1: i32, %arg2: i32, %arg3: memref<2x1x64x256xbf16, #tpu.memory_space<vmem>>, %arg4: memref<1x64x64xbf16, #tpu.memory_space<vmem>>, %arg5: memref<1x1x64xf32, #tpu.memory_space<vmem>>, %arg6: memref<1x64x128xbf16, #tpu.memory_space<vmem>>, %arg7: memref<1x1x128xf32, #tpu.memory_space<vmem>>, %arg8: memref<1x2x128xf32, #tpu.memory_space<vmem>>, %arg9: memref<2x64xf32, #tpu.memory_space<vmem>>) attributes {dimension_semantics = [#tpu.dimension_semantics<parallel>, #tpu.dimension_semantics<parallel>, #tpu.dimension_semantics<arbitrary>], iteration_bounds = array<i64: 2, 1, 1>, scalar_prefetch = 0 : i64, scratch_operands = 1 : i64, tpu.core_type = #tpu.core_type<tc>, window_params = [{transform_indices = @transform_0, window_bounds = array<i64: 2, 1, 64, 256>}, {transform_indices = @transform_1, window_bounds = array<i64: 1, 64, 64>}, {transform_indices = @transform_2, window_bounds = array<i64: 1, 1, 64>}, {transform_indices = @transform_3, window_bounds = array<i64: 1, 64, 128>}, {transform_indices = @transform_4, window_bounds = array<i64: 1, 1, 128>}, {transform_indices = @transform_5, window_bounds = array<i64: 1, 2, 128>}]} {
    %c0_i32 = arith.constant 0 : i32
    %0 = arith.cmpi eq, %arg2, %c0_i32 : i32
    %1 = arith.extui %0 : i1 to i32
    %c0_i32_0 = arith.constant 0 : i32
    %2 = arith.cmpi ne, %1, %c0_i32_0 : i32
    scf.if %2 {
      %cst_10 = arith.constant 0.000000e+00 : f32
      %13 = vector.broadcast %cst_10 : f32 to vector<2x64xf32>
      %c0_11 = arith.constant 0 : index
      %c0_12 = arith.constant 0 : index
      %14 = vector.load %arg9[%c0_11, %c0_12] : memref<2x64xf32, #tpu.memory_space<vmem>>, vector<2x64xf32>
      tpu.vector_store %arg9[%c0_11, %c0_12], %13 {strides = array<i32>} : memref<2x64xf32, #tpu.memory_space<vmem>>, vector<2x64xf32>,
    } else {
    }
    %c0 = arith.constant 0 : index
    %c0_1 = arith.constant 0 : index
    %3 = vector.load %arg9[%c0, %c0_1] : memref<2x64xf32, #tpu.memory_space<vmem>>, vector<2x64xf32>
    %c0_2 = arith.constant 0 : index
    %c0_3 = arith.constant 0 : index
    %c0_4 = arith.constant 0 : index
    %c0_5 = arith.constant 0 : index
    %4 = vector.load %arg3[%c0_2, %c0_3, %c0_4, %c0_5] : memref<2x1x64x256xbf16, #tpu.memory_space<vmem>>, vector<2x1x64x256xbf16>
    %5 = vector.shape_cast %4 : vector<2x1x64x256xbf16> to vector<2x64x256xbf16>
    %6 = arith.extf %5 : vector<2x64x256xbf16> to vector<2x64x256xf32>
    %cst = arith.constant dense<0.000000e+00> : vector<2x64xf32>
    %7 = vector.multi_reduction <add>, %6, %cst [2] : vector<2x64x256xf32> to vector<2x64xf32>
    %8 = arith.addf %3, %7 : vector<2x64xf32>
    %c0_6 = arith.constant 0 : index
    %c0_7 = arith.constant 0 : index
    %9 = vector.load %arg9[%c0_6, %c0_7] : memref<2x64xf32, #tpu.memory_space<vmem>>, vector<2x64xf32>
    tpu.vector_store %arg9[%c0_6, %c0_7], %8 {strides = array<i32>} : memref<2x64xf32, #tpu.memory_space<vmem>>, vector<2x64xf32>,
    %c0_i32_8 = arith.constant 0 : i32
    %10 = arith.cmpi eq, %arg2, %c0_i32_8 : i32
    %11 = arith.extui %10 : i1 to i32
    %c0_i32_9 = arith.constant 0 : i32
    %12 = arith.cmpi ne, %11, %c0_i32_9 : i32
    scf.if %12 {
      %c0_10 = arith.constant 0 : index
      %c0_11 = arith.constant 0 : index
      %13 = vector.load %arg9[%c0_10, %c0_11] : memref<2x64xf32, #tpu.memory_space<vmem>>, vector<2x64xf32>
      %cst_12 = arith.constant 3.906250e-03 : f32
      %14 = vector.broadcast %cst_12 : f32 to vector<2x64xf32>
      %15 = arith.mulf %13, %14 : vector<2x64xf32>
      %16 = arith.truncf %15 : vector<2x64xf32> to vector<2x64xbf16>
      %c0_13 = arith.constant 0 : index
      %c0_14 = arith.constant 0 : index
      %c0_15 = arith.constant 0 : index
      %17 = vector.load %arg4[%c0_13, %c0_14, %c0_15] : memref<1x64x64xbf16, #tpu.memory_space<vmem>>, vector<1x64x64xbf16>
      %18 = vector.shape_cast %17 : vector<1x64x64xbf16> to vector<64x64xbf16>
      %cst_16 = arith.constant dense<0.000000e+00> : vector<2x64xf32>
      %19 = tpu.matmul %16, %18, %cst_16 {dimension_numbers = #tpu.dot_dimension_numbers<[1], [0], [0], [1], [0, 0, 1, 1], [], []>} : vector<2x64xbf16>, vector<64x64xbf16>, vector<2x64xf32> -> vector<2x64xf32>
      %c0_17 = arith.constant 0 : index
      %c0_18 = arith.constant 0 : index
      %c0_19 = arith.constant 0 : index
      %20 = vector.load %arg5[%c0_17, %c0_18, %c0_19] : memref<1x1x64xf32, #tpu.memory_space<vmem>>, vector<1x1x64xf32>
      %21 = vector.shape_cast %20 : vector<1x1x64xf32> to vector<1x64xf32>
      %22 = vector.broadcast %21 : vector<1x64xf32> to vector<2x64xf32>
      %23 = arith.addf %19, %22 : vector<2x64xf32>
      %cst_20 = arith.constant 0.000000e+00 : f32
      %24 = vector.broadcast %cst_20 : f32 to vector<2x64xf32>
      %25 = arith.maximumf %23, %24 : vector<2x64xf32>
      %26 = arith.truncf %25 : vector<2x64xf32> to vector<2x64xbf16>
      %c0_21 = arith.constant 0 : index
      %c0_22 = arith.constant 0 : index
      %c0_23 = arith.constant 0 : index
      %27 = vector.load %arg6[%c0_21, %c0_22, %c0_23] : memref<1x64x128xbf16, #tpu.memory_space<vmem>>, vector<1x64x128xbf16>
      %28 = vector.shape_cast %27 : vector<1x64x128xbf16> to vector<64x128xbf16>
      %cst_24 = arith.constant dense<0.000000e+00> : vector<2x128xf32>
      %29 = tpu.matmul %26, %28, %cst_24 {dimension_numbers = #tpu.dot_dimension_numbers<[1], [0], [0], [1], [0, 0, 1, 1], [], []>} : vector<2x64xbf16>, vector<64x128xbf16>, vector<2x128xf32> -> vector<2x128xf32>
      %c0_25 = arith.constant 0 : index
      %c0_26 = arith.constant 0 : index
      %c0_27 = arith.constant 0 : index
      %30 = vector.load %arg7[%c0_25, %c0_26, %c0_27] : memref<1x1x128xf32, #tpu.memory_space<vmem>>, vector<1x1x128xf32>
      %31 = vector.shape_cast %30 : vector<1x1x128xf32> to vector<1x128xf32>
      %32 = vector.broadcast %31 : vector<1x128xf32> to vector<2x128xf32>
      %33 = arith.addf %29, %32 : vector<2x128xf32>
      %34 = arith.mulf %33, %33 : vector<2x128xf32>
      %cst_28 = arith.constant dense<0.000000e+00> : vector<2xf32>
      %35 = vector.multi_reduction <add>, %34, %cst_28 [1] : vector<2x128xf32> to vector<2xf32>
      %36 = vector.shape_cast %35 : vector<2xf32> to vector<2x1xf32>
      %cst_29 = arith.constant 1.000000e-24 : f32
      %37 = vector.broadcast %cst_29 : f32 to vector<2x1xf32>
      %38 = arith.maximumf %36, %37 : vector<2x1xf32>
      %39 = math.rsqrt %38 : vector<2x1xf32>
      %40 = vector.broadcast %39 : vector<2x1xf32> to vector<2x128xf32>
      %41 = arith.mulf %33, %40 : vector<2x128xf32>
      %c0_30 = arith.constant 0 : index
      %c0_31 = arith.constant 0 : index
      %c0_32 = arith.constant 0 : index
      %42 = vector.load %arg8[%c0_30, %c0_31, %c0_32] : memref<1x2x128xf32, #tpu.memory_space<vmem>>, vector<1x2x128xf32>
      %43 = vector.shape_cast %42 : vector<1x2x128xf32> to vector<2x128xf32>
      %44 = vector.shape_cast %41 : vector<2x128xf32> to vector<1x2x128xf32>
      tpu.vector_store %arg8[%c0_30, %c0_31, %c0_32], %44 {strides = array<i32>} : memref<1x2x128xf32, #tpu.memory_space<vmem>>, vector<1x2x128xf32>,
    } else {
    }
    return
  }
  func.func @transform_0(%arg0: i32, %arg1: i32, %arg2: i32) -> (i32, i32, i32, i32) {
    %c0_i32 = arith.constant 0 : i32
    %c0_i32_0 = arith.constant 0 : i32
    return %arg1, %arg0, %c0_i32, %arg2 : i32, i32, i32, i32
  }
  func.func @transform_1(%arg0: i32, %arg1: i32, %arg2: i32) -> (i32, i32, i32) {
    %c0_i32 = arith.constant 0 : i32
    %c0_i32_0 = arith.constant 0 : i32
    %c0_i32_1 = arith.constant 0 : i32
    return %arg0, %c0_i32, %c0_i32_0 : i32, i32, i32
  }
  func.func @transform_2(%arg0: i32, %arg1: i32, %arg2: i32) -> (i32, i32, i32) {
    %c0_i32 = arith.constant 0 : i32
    %c0_i32_0 = arith.constant 0 : i32
    %c0_i32_1 = arith.constant 0 : i32
    return %arg0, %c0_i32, %c0_i32_0 : i32, i32, i32
  }
  func.func @transform_3(%arg0: i32, %arg1: i32, %arg2: i32) -> (i32, i32, i32) {
    %c0_i32 = arith.constant 0 : i32
    %c0_i32_0 = arith.constant 0 : i32
    %c0_i32_1 = arith.constant 0 : i32
    return %arg0, %c0_i32, %c0_i32_0 : i32, i32, i32
  }
  func.func @transform_4(%arg0: i32, %arg1: i32, %arg2: i32) -> (i32, i32, i32) {
    %c0_i32 = arith.constant 0 : i32
    %c0_i32_0 = arith.constant 0 : i32
    %c0_i32_1 = arith.constant 0 : i32
    return %arg0, %c0_i32, %c0_i32_0 : i32, i32, i32
  }
  func.func @transform_5(%arg0: i32, %arg1: i32, %arg2: i32) -> (i32, i32, i32) {
    %c0_i32 = arith.constant 0 : i32
    %c0_i32_0 = arith.constant 0 : i32
    return %arg0, %arg1, %c0_i32 : i32, i32, i32
  }
}

</mosaic_0001>

<bundles_post_ra>
// kernel: fwd.2
= control target key start
LH: loop header
LB: loop body
LE: loop exit
PB: predicated region body
PF: predicated region fallthrough
CT: control target
= control target key end

     0   :  { %10 = vsyncpa [#allocation4], 0  ;;  %s1187_s0 = inlined_call_operand.hbm [shape: bf16[2,2,64,256], index: 0, kind: input, shape index: {}]   ;;  %s1188_s1 = inlined_call_operand.vmem [shape: bf16[2,64,64], index: 1, kind: input, shape index: {}]   ;;  %s1189_s2 = inlined_call_operand.vmem [shape: f32[2,1,64], index: 2, kind: input, shape index: {}]   ;;  %s1190_s3 = inlined_call_operand.vmem [shape: bf16[2,64,128], index: 3, kind: input, shape index: {}]   ;;  %s1191_s4 = inlined_call_operand.vmem [shape: f32[2,1,128], index: 4, kind: input, shape index: {}]   ;;  %s1192_s5 = inlined_call_operand.vmem [shape: f32[2,2,128], index: 5, kind: output, shape index: {}]  }
   0x1   :  { %12 = vsyncpa [#allocation4 + $0x1], 0  ;;  %s1030_s18 = smov 0   ;;  %s1032_s19 = smov 0  }
   0x2   :  { %s1034_s20 = smov 0   ;;  %s1036_s21 = smov 0  }
   0x3   :  { %s1038_s22 = smov 0   ;;  %s1040_s23 = smov 0  }
   0x4 LB: > { %s812_s24 = sadd.s32 4294967295, %s992_s23   ;;  %s37_s25 = sadd.s32 1, %s988_s22  ;;  %s992_s23 = sphi %s1040_s23, %s18_s23   ;;  %s988_s22 = sphi %s1038_s22, %s1199_s22   ;;  %s984_s21 = sphi %s1036_s21, %s1198_s21   ;;  %s980_s20 = sphi %s1034_s20, %s1197_s20   ;;  %s976_s19 = sphi %s1032_s19, %s1196_s19   ;;  %s972_s18 = sphi %s1030_s18, %s1195_s18  }
   0x5   : > { %p39_p0 = scmp.ge.s32.totalorder %s37_s25, 2  ;;  %s48_s26 = sadd.s32 1, %s980_s20 }
   0x6   : > { %p55_p1 = scmp.ne.s32.totalorder %s980_s20, %s976_s19  ;;  %p56_p2 = scmp.eq.s32.totalorder %s992_s23, 0 }
   0x7   : > { %s1201_s25 = smov (%p39_p0, %s37_s25), 0  ;;  %p61_p4 = scmp.ne.s32.totalorder %s976_s19, %s972_s18 }
   0x8   : > { %p1066_p3 = por %p56_p2, %p55_p1  ;;  %s42_s28 = ssub.s32 %s988_s22, %s1201_s25 }
   0x9   : > { %p62_p5 = scmp.eq.s32.totalorder %s812_s24, 0  ;;  %p46_p6 = scmp.eq.s32.totalorder %s42_s28, 0 }
   0xa   : > { %p815_p8 = scmp.ge.s32.totalorder %s992_s23, 2 }
   0xb   : > { %p1073_p7 = por %p62_p5, %p61_p4 }
   0xc   : > { %s1078_s30 = scalar_select %p46_p6, %s980_s20, %s48_s26  }
   0xd   : > { %213 = sbr.rel (%p815_p8) target bundleno = 31 (0x1f), region = 16 }
  0x12   : > { %s217_s6 = sand.u32 1, %s980_s20   ;;  %s864_s7 = sshll.u32 %s988_s22, 6 }
  0x13   : > { %s816_s8 = sshll.u32 %s217_s6, 7  ;;  %s231_s11 = scalar_lea.hbm %s1187_s0, %s864_s7 }
  0x14   : > { %s875_s12 = scalar_select %p1066_p3, [#allocation0], [#allocation7] }
  0x15   : > { %s244_s13 = sshll.u32 %s231_s11, 4  ;;  %s221_s14 = scalar_lea.vmem [#allocation3], %s816_s8  ;;  %s245_s13 = int_to_ptr.hbm [resolvable:$true] %s244_s13 }
  0x16   : > { %s246_s15 = sshll.u32 %s221_s14, 4  ;;  %s236_s16 = sld [smem:[%s875_s12]]   ;;  %s247_s15 = int_to_ptr.vmem [resolvable:$true] %s246_s15 }
  0x17   : > { %s994_s17 = smov 2048   ;;  %s995_s18 = smov 1024  }
  0x18   : > { %876 = sst [smem:[#allocation6]] (%p1066_p3), %s994_s17  ;;  %s996_s24 = smov 8  }
  0x19   : > { %877 = sst [smem:[#allocation6 + $0x1]] (%p1066_p3), %s995_s18  ;;  %s997_s26 = smov 128  }
  0x1a   : > { %878 = sst [smem:[#allocation6 + $0x2]] (%p1066_p3), %s996_s24  ;;  %s218_s8 = scalar_lea.sflag [#allocation4], %s217_s6 }
  0x1b   : > { %879 = sst [smem:[#allocation6 + $0x3]] (%p1066_p3), %s997_s26  ;;  %s998_s9 = smov [#allocation5]  }
  0x1c   : > { %s819_s28 = sshll.u32 %s236_s16, 26  ;;  %880 = sst [smem:[#allocation6 + $0x4]] (%p1066_p3), %s997_s26 }
  0x1d   : > { %s820_s7 = sadd.s32 134217728, %s819_s28  ;;  %881 = sst [smem:[#allocation6 + $0x5]] (%p1066_p3), %s996_s24 }
  0x1e   : > { %882 = dma.general (%p1066_p3), %s245_s13, 2048, %s247_s15, %s218_s8, %s998_s9, [#allocation6], %s820_s7, 0  }
  0x1f PF: > { %p821_p9 = scmp.ge.s32.totalorder %s992_s23, 1  ;;  %p295_p10 = scmp.lt.s32.totalorder %s992_s23, 3 }
  0x21   : > { %p296_p11 = pnand %p821_p9, %p295_p10 }
  0x22   : > { %s301_s10 = sand.u32 (!%p296_p11), 1, %s976_s19  }
  0x23   : > { %299 = sbr.rel (%p296_p11) target bundleno = 623 (0x26f), region = 40  ;;  %s822_s11 = sshll.u32 (!%p296_p11), %s301_s10, 7 }
  0x24   : > { %s302_s12 = scalar_lea.sflag (!%p296_p11), [#allocation4], %s301_s10  ;;  %s1105_s14 = scalar_lea.vmem (!%p296_p11), [#allocation3], %s822_s11 }
  0x28   : > { %967 = dma.done.wait (%p1073_p7), %s302_s12, 2048  }
  0x29   : > { %969 = vsyncadd (%p1073_p7), %s302_s12, 4294965248  ;;  %v392_v0 = vld [vmem:[%s1105_s14 + $0x40] sm:$0xff]  ;;  %v386_v2 = vld [vmem:[%s1105_s14 + $0x10] sm:$0xff]  ;;  %p353_p12 = scmp.lt.s32.totalorder %s984_s21, 1  ;;  %vm381_vm0 = vcmask 517120   ;;  %vm501_vm1 = vcmask 130112  }
  0x2a   : > { %v384_v1 = vld [vmem:[%s1105_s14] sm:$0xff]  ;;  %v416_v3 = vunpack.c.l.bf16 %v392_v0  ;;  %v417_v4 = vunpack.c.h.bf16 %v392_v0  ;;  %v404_v7 = vunpack.c.l.bf16 %v386_v2  ;;  %v405_v8 = vunpack.c.h.bf16 %v386_v2  ;;  %v393_v9 = vld [vmem:[%s1105_s14 + $0x48] sm:$0xff]  ;;  %v394_v13 = vld [vmem:[%s1105_s14 + $0x50] sm:$0xff] }
  0x2b   : > { %v400_v5 = vunpack.c.l.bf16 %v384_v1  ;;  %v401_v6 = vunpack.c.h.bf16 %v384_v1  ;;  %v385_v10 = vld [vmem:[%s1105_s14 + $0x8] sm:$0xff]  ;;  %v418_v15 = vunpack.c.l.bf16 %v393_v9  ;;  %v419_v16 = vunpack.c.h.bf16 %v393_v9  ;;  %v395_v24 = vld [vmem:[%s1105_s14 + $0x58] sm:$0xff]  ;;  %v388_v26 = vld [vmem:[%s1105_s14 + $0x20] sm:$0xff]  ;;  %s1203_s21 = smov (!%p353_p12, %s984_s21), 1 }
  0x2c   : > { %v456_v11 = vadd.f32 %v417_v4, %v416_v3  ;;  %v438_v14 = vadd.f32 %v405_v8, %v404_v7  ;;  %v402_v17 = vunpack.c.l.bf16 %v385_v10  ;;  %v403_v18 = vunpack.c.h.bf16 %v385_v10  ;;  %v387_v25 = vld [vmem:[%s1105_s14 + $0x18] sm:$0xff]  ;;  %v389_v36 = vld [vmem:[%s1105_s14 + $0x28] sm:$0xff]  ;;  %v396_v37 = vld [vmem:[%s1105_s14 + $0x60] sm:$0xff]  ;;  %s360_s6 = scalar_lea.vmem %s1189_s2, %s1203_s21  ;;  %s865_s13 = sshll.u32 %s1203_s21, 5 }
  0x2d   : > { %v432_v12 = vadd.f32 %v401_v6, %v400_v5  ;;  %v420_v19 = vunpack.c.l.bf16 %v394_v13  ;;  %v421_v20 = vunpack.c.h.bf16 %v394_v13  ;;  %v459_v21 = vadd.f32 %v419_v16, %v418_v15  ;;  %v397_v38 = vld [vmem:[%s1105_s14 + $0x68] sm:$0xff]  ;;  %v398_v48 = vld [vmem:[%s1105_s14 + $0x70] sm:$0xff]  ;;  %v391_v50 = vld [vmem:[%s1105_s14 + $0x38] sm:$0xff]  ;;  %s357_s17 = scalar_lea.vmem %s1188_s1, %s865_s13  ;;  %s1143_s26 = scalar_lea.vmem %s1190_s3, %s865_s13 }
  0x2e   : > { %457 = vadd.xlane.f32.xlu1 %v456_v11  ;;  %439 = vadd.xlane.f32.xlu2 %v438_v14  ;;  %v435_v22 = vadd.f32 %v403_v18, %v402_v17  ;;  %v422_v27 = vunpack.c.l.bf16 %v395_v24  ;;  %v423_v28 = vunpack.c.h.bf16 %v395_v24  ;;  %v406_v29 = vunpack.c.l.bf16 %v387_v25  ;;  %v390_v49 = vld [vmem:[%s1105_s14 + $0x30] sm:$0xff]  ;;  %v399_v60 = vld [vmem:[%s1105_s14 + $0x78] sm:$0xff]  ;;  %v868_v11 = vld [vmem:[%s357_s17 + $0x8] sm:$0xff]  ;;  %s368_s8 = scalar_lea.vmem %s1191_s4, %s1203_s21  ;;  %s827_s11 = sshll.u32 %s1203_s21, 1 }
  0x2f   : > { %433 = vadd.xlane.f32.xlu0 %v432_v12  ;;  %v462_v23 = vadd.f32 %v421_v20, %v420_v19  ;;  %v407_v30 = vunpack.c.h.bf16 %v387_v25  ;;  %v408_v31 = vunpack.c.l.bf16 %v388_v26  ;;  %v409_v32 = vunpack.c.h.bf16 %v388_v26  ;;  %v870_v7 = vld [vmem:[%s357_s17 + $0x18] sm:$0xff]  ;;  %v869_v8 = vld [vmem:[%s357_s17 + $0x10] sm:$0xff]  ;;  %v867_v14 = vld [vmem:[%s357_s17] sm:$0xff]  ;;  %s375_s27 = scalar_lea.vmem %s1192_s5, %s827_s11 }
  0x30   : > { %v465_v33 = vadd.f32 %v423_v28, %v422_v27  ;;  %v410_v39 = vunpack.c.l.bf16 %v389_v36  ;;  %v411_v40 = vunpack.c.h.bf16 %v389_v36  ;;  %v424_v41 = vunpack.c.l.bf16 %v396_v37  ;;  %598 = vmatpush.bf16.msra.mxu0 %v870_v7  ;;  %v873_v27 = vld [vmem:[%s1143_s26 + $0x10] sm:$0xff] }
  0x31   : > { %v441_v34 = vadd.f32 %v407_v30, %v406_v29  ;;  %v444_v35 = vadd.f32 %v409_v32, %v408_v31  ;;  %v425_v42 = vunpack.c.h.bf16 %v396_v37  ;;  %v426_v43 = vunpack.c.l.bf16 %v397_v38 }
  0x32   : > { %v427_v44 = vunpack.c.h.bf16 %v397_v38  ;;  %v447_v45 = vadd.f32 %v411_v40, %v410_v39  ;;  %v428_v51 = vunpack.c.l.bf16 %v398_v48  ;;  %v429_v52 = vunpack.c.h.bf16 %v398_v48 }
  0x33   : > { %v468_v46 = vadd.f32 %v425_v42, %v424_v41  ;;  %v412_v53 = vunpack.c.l.bf16 %v390_v49  ;;  %v413_v54 = vunpack.c.h.bf16 %v390_v49  ;;  %v414_v55 = vunpack.c.l.bf16 %v391_v50 }
  0x34   : > { %v471_v47 = vadd.f32 %v427_v44, %v426_v43  ;;  %v415_v56 = vunpack.c.h.bf16 %v391_v50  ;;  %v474_v57 = vadd.f32 %v429_v52, %v428_v51  ;;  %v430_v61 = vunpack.c.l.bf16 %v399_v60  ;;  %599 = vmatpush.bf16.msra.mxu0 %v869_v8 }
  0x35   : > { %v450_v58 = vadd.f32 %v413_v54, %v412_v53  ;;  %v431_v62 = vunpack.c.h.bf16 %v399_v60  ;;  %v999_v3 = vmov 0.0   ;;  %v496_v12 = vlaneseq }
  0x36   : > { %460 = vadd.xlane.f32.xlu1 %v459_v21  ;;  %463 = vadd.xlane.f32.xlu2 %v462_v23  ;;  %v453_v59 = vadd.f32 %v415_v56, %v414_v55  ;;  %382 = vst.msk [vmem:[#allocation2] sm:$0x3] %vm381_vm0, %v999_v3  ;;  %v874_v23 = vld [vmem:[%s1143_s26 + $0x18] sm:$0xff]  ;;  %vm505_vm2 = vcmask 195712   ;;  %vm509_vm3 = vcmask 261312   ;;  %vm513_vm4 = vcmask 326912  }
  0x37   : > { %436 = vadd.xlane.f32.xlu0 %v435_v22  ;;  %v477_v63 = vadd.f32 %v431_v62, %v430_v61  ;;  %v497_v15 = vand.u32 127, %v496_v12  ;;  %652 = vmatpush.bf16.msra.mxu1 %v874_v23  ;;  %vm517_vm5 = vcmask 392512   ;;  %vm521_vm6 = vcmask 458112   ;;  %v939_v12 = vld [vmem:[%s368_s8] ss:$0 sm:$0xff] }
  0x38   : > { %600 = vmatpush.bf16.msra.mxu0 %v868_v11  ;;  %vm525_vm7 = vcmask 523712   ;;  %vm542_vm8 = vcmask 1041409   ;;  %vm590_vm9 = vcmask 523264   ;;  %vm662_vm10 = vcmask 1041408  }
  0x39   : > { %v499_v16 = vadd.s32 4294967288, %v497_v15  ;;  %v503_v19 = vadd.s32 4294967280, %v497_v15  ;;  %v507_v22 = vadd.s32 4294967272, %v497_v15  ;;  %v511_v29 = vadd.s32 4294967264, %v497_v15 }
  0x3a   : > { %v515_v32 = vadd.s32 4294967256, %v497_v15  ;;  %v523_v44 = vadd.s32 4294967240, %v497_v15 }
  0x3b   : > { %653 = vmatpush.bf16.msra.mxu1 %v873_v27 }
  0x3c   : > { %601 = vmatpush.bf16.msra.mxu0 %v867_v14 }
  0x3d   : > { %v383_v60 = vld [vmem:[#allocation2] sm:$0x3] }
  0x3e   : > { %466 = vadd.xlane.f32.xlu1 %v465_v33  ;;  %445 = vadd.xlane.f32.xlu2 %v444_v35 }
  0x3f   : > { %442 = vadd.xlane.f32.xlu0 %v441_v34  ;;  %v519_v34 = vadd.s32 4294967248, %v497_v15 }
  0x46   : > { %448 = vadd.xlane.f32.xlu1 %v447_v45  ;;  %472 = vadd.xlane.f32.xlu2 %v471_v47 }
  0x47   : > { %469 = vadd.xlane.f32.xlu0 %v468_v46 }
  0x4e   : > { %475 = vadd.xlane.f32.xlu1 %v474_v57  ;;  %454 = vadd.xlane.f32.xlu2 %v453_v59 }
  0x4f   : > { %451 = vadd.xlane.f32.xlu0 %v450_v58 }
  0x57   : > { %478 = vadd.xlane.f32.xlu0 %v477_v63 }
  0xa1   : > { %v458_v0 = vpop.xlane.xlu1 %457  ;;  %v440_v2 = vpop.xlane.xlu2 %439 }
  0xa2   : > { %v434_v1 = vpop.xlane.xlu0 %433  ;;  %v527_v24 = vperm.slane %v458_v0, %v497_v15  ;;  %v504_v28 = vperm.slane %v440_v2, %v503_v19 }
  0xa3   : > { %v498_v25 = vperm.slane %v434_v1, %v497_v15 }
  0xa9   : > { %v461_v4 = vpop.xlane.xlu1 %460  ;;  %v464_v6 = vpop.xlane.xlu2 %463 }
  0xaa   : > { %v437_v5 = vpop.xlane.xlu0 %436  ;;  %v528_v26 = vperm.slane %v461_v4, %v499_v16  ;;  %v530_v33 = vperm.slane %v464_v6, %v503_v19  ;;  %v872_v4 = vld [vmem:[%s1143_s26 + $0x8] sm:$0xff]  ;;  %v938_v6 = vld [vmem:[%s360_s6] ss:$0 sm:$0xff] }
  0xab   : > { %v500_v21 = vperm.slane %v437_v5, %v499_v16  ;;  %654 = vmatpush.bf16.msra.mxu1 %v872_v4  ;;  %v871_v5 = vld [vmem:[%s1143_s26] sm:$0xff] }
  0xac   : > { %v529_v36 = vsel %vm501_vm1, %v528_v26, %v527_v24 }
  0xad   : > { %v502_v30 = vsel %vm501_vm1, %v500_v21, %v498_v25  ;;  %v531_v45 = vsel %vm505_vm2, %v530_v33, %v529_v36 }
  0xae   : > { %v506_v38 = vsel %vm505_vm2, %v504_v28, %v502_v30 }
  0xaf   : > { %655 = vmatpush.bf16.msra.mxu1 %v871_v5 }
  0xb1   : > { %v467_v9 = vpop.xlane.xlu1 %466  ;;  %v446_v13 = vpop.xlane.xlu2 %445 }
  0xb2   : > { %v443_v10 = vpop.xlane.xlu0 %442  ;;  %v532_v37 = vperm.slane %v467_v9, %v507_v22  ;;  %v512_v39 = vperm.slane %v446_v13, %v511_v29 }
  0xb3   : > { %v508_v31 = vperm.slane %v443_v10, %v507_v22 }
  0xb4   : > { %v533_v48 = vsel %vm509_vm3, %v532_v37, %v531_v45 }
  0xb5   : > { %v510_v41 = vsel %vm509_vm3, %v508_v31, %v506_v38 }
  0xb6   : > { %v514_v50 = vsel %vm513_vm4, %v512_v39, %v510_v41 }
  0xb9   : > { %v449_v18 = vpop.xlane.xlu1 %448  ;;  %v473_v20 = vpop.xlane.xlu2 %472 }
  0xba   : > { %v470_v17 = vpop.xlane.xlu0 %469  ;;  %v516_v42 = vperm.slane %v449_v18, %v515_v32  ;;  %v536_v49 = vperm.slane %v473_v20, %v515_v32 }
  0xbb   : > { %v534_v40 = vperm.slane %v470_v17, %v511_v29 }
  0xbc   : > { %v518_v53 = vsel %vm517_vm5, %v516_v42, %v514_v50 }
  0xbd   : > { %v535_v51 = vsel %vm513_vm4, %v534_v40, %v533_v48 }
  0xbe   : > { %v537_v57 = vsel %vm517_vm5, %v536_v49, %v535_v51 }
  0xc1   : > { %v476_v43 = vpop.xlane.xlu1 %475  ;;  %v455_v47 = vpop.xlane.xlu2 %454 }
  0xc2   : > { %v452_v35 = vpop.xlane.xlu0 %451  ;;  %v538_v52 = vperm.slane %v476_v43, %v519_v34  ;;  %v524_v54 = vperm.slane %v455_v47, %v523_v44 }
  0xc3   : > { %v520_v46 = vperm.slane %v452_v35, %v519_v34 }
  0xc4   : > { %v539_v59 = vsel %vm521_vm6, %v538_v52, %v537_v57 }
  0xc5   : > { %v522_v55 = vsel %vm521_vm6, %v520_v46, %v518_v53 }
  0xc6   : > { %v526_v61 = vsel %vm525_vm7, %v524_v54, %v522_v55 }
  0xca   : > { %v479_v56 = vpop.xlane.xlu0 %478 }
  0xcb   : > { %v540_v58 = vperm.slane %v479_v56, %v523_v44 }
  0xcd   : > { %v541_v62 = vsel %vm525_vm7, %v540_v58, %v539_v59 }
  0xce   : > { %v543_v63 = vsel %vm542_vm8, %v541_v62, %v526_v61 }
  0xcf   : > { %v545_v0 = vadd.f32 %v543_v63, %v383_v60 }
  0xd1   : > { %547 = vst.msk [vmem:[#allocation2] sm:$0x3] %vm381_vm0, %v545_v0 }
  0xd8   : > { %v551_v1 = vld [vmem:[#allocation2] sm:$0x3] }
  0xd9   : > { %v552_v2 = vmul.f32 0.00390625, %v551_v1 }
  0xdb   : > { %v553_v3 = vpack.c.bf16 %v552_v2, %v552_v2 }
  0xdd   : > { %844 = vmatmul.msk.bf16.vlgmr.msra.gmra.mxu0 %vm590_vm9, %v553_v3 }
 0x15a   : > { %v603_v7 = vpop.f32.mrf.mxu0 }
 0x15b   : > { %v604_v8 = vadd.f32 %v938_v6, %v603_v7 }
 0x15d   : > { %v607_v9 = vmax.f32 %v604_v8, 0.0 }
 0x15f   : > { %v608_v10 = vpack.c.bf16 %v607_v9, %v607_v9 }
 0x161   : > { %861 = vmatmul.msk.bf16.vlgmr.msra.gmra.mxu1 %vm590_vm9, %v608_v10 }
 0x162   : > { %v605_v11 = vpop.f32.mrf.mxu0 }
 0x1de   : > { %v657_v13 = vpop.f32.mrf.mxu1 }
 0x1df   : > { %v658_v14 = vadd.f32 %v939_v12, %v657_v13 }
 0x1e1   : > { %v661_v15 = vmul.f32 %v658_v14, %v658_v14 }
 0x1e3   : > { %v663_v16 = vsel %vm662_vm10, %v661_v15, 0.0 }
 0x1e4   : > { %664 = vadd.xlane.f32.xlu1 %v663_v16 }
 0x1e6   : > { %v659_v17 = vpop.f32.mrf.mxu1 }
 0x257   : > { %v665_v18 = vpop.xlane.xlu1 %664 }
 0x258   : > { %v666_v19 = vmax.f32 %v665_v18, 1e-24 }
 0x25a   : > { %940 = vrsqrt.f32 %v666_v19  ;;  %vm673_vm12 = vweird.f32 %v666_v19 }
 0x260   : > { %v941_v20 = vpop.eup %940 }
 0x261   : > { %v668_v21 = vmul.f32 %v941_v20, %v666_v19  ;;  %vm674_vm11 = vweird.f32 %v941_v20 }
 0x262   : > { %vm675_vm13 = vmor %vm673_vm12, %vm674_vm11 }
 0x263   : > { %v669_v22 = vmul.f32 %v941_v20, %v668_v21 }
 0x265   : > { %v670_v23 = vmul.f32 0.5, %v669_v22 }
 0x267   : > { %v671_v24 = vsub.f32 1.5, %v670_v23 }
 0x269   : > { %v672_v25 = vmul.f32 %v941_v20, %v671_v24 }
 0x26b   : > { %v676_v26 = vsel %vm675_vm13, %v941_v20, %v672_v25 }
 0x26c   : > { %v677_v27 = vmul.f32 %v676_v26, %v658_v14 }
 0x26e   : > { %678 = vst [vmem:[%s375_s27] sm:$0x3] %v677_v27 }
 0x26f PF: > { %s18_s23 = sadd.s32 1, %s992_s23   ;;  %s1195_s18 = smov %s976_s19 }
 0x270   : > { %p15_p13 = scmp.ge.s32.totalorder %s18_s23, 4   ;;  %s1196_s19 = smov %s980_s20 }
 0x271   : > { %s1197_s20 = smov %s1078_s30  ;;  %s1198_s21 = smov %s988_s22 }
 0x272   : > { %s1199_s22 = smov %s1201_s25  ;;  %17 = sbr.rel (!%p15_p13) target bundleno = 4 (0x4), region = 105 }
 0x277   :  { %704 = vsyncpa [#allocation4], 1 }
 0x278   :  { %706 = vsyncpa [#allocation4 + $0x1], 1 }

// kernel: fwd.3
= control target key start
LH: loop header
LB: loop body
LE: loop exit
PB: predicated region body
PF: predicated region fallthrough
CT: control target
= control target key end

     0   :  { %7 = vsyncpa [#allocation3], 0  ;;  %s1643_s12 = smov [#allocation2]   ;;  %s1644_s14 = smov 960   ;;  %s1707_s0 = inlined_call_operand.vmem [shape: f32[2,2,128], index: 0, kind: input, shape index: {}]   ;;  %s1708_s1 = inlined_call_operand.hbm [shape: bf16[128,1920], index: 1, kind: input, shape index: {}]   ;;  %s1709_s2 = inlined_call_operand.vmem [shape: f32[2,1920], index: 2, kind: output, shape index: {}]  }
   0x1   :  { %s14_s11 = sshll.u32 %s1708_s1, 4  ;;  %s16_s13 = sshll.u32 %s1643_s12, 4  ;;  %s15_s11 = int_to_ptr.hbm [resolvable:$true] %s14_s11  ;;  %s17_s13 = int_to_ptr.vmem [resolvable:$true] %s16_s13 }
   0x2   :  { %s1645_s15 = smov 60  }
   0x3   :  { %22 = dma.hbm_to_vmem [thread:$0]  %s15_s11, 15360, %s17_s13, [#allocation3], %s1644_s14, %s1644_s14, %s1645_s15  }
   0x4   :  { %1641 = dma.done.wait [#allocation3], 15360  }
   0x5   :  { %1642 = vsyncadd [#allocation3], 4294951936  ;;  %v1436_v0 = vld [vmem:[#allocation2 + $0x348] sm:$0xf]  ;;  %v1606_v1 = vld [vmem:[#allocation2 + $0x380] sm:$0xf0] }
   0x6   :  { %v1599_v2 = vld [vmem:[#allocation2 + $0x34c] sm:$0xf]  ;;  %v1437_v3 = vor.u32 %v1606_v1, %v1436_v0  ;;  %v1438_v4 = vld [vmem:[#allocation2 + $0x384] sm:$0xf0]  ;;  %v1444_v5 = vld [vmem:[#allocation2 + $0x350] sm:$0xf] }
   0x7   :  { %v1607_v6 = vld [vmem:[#allocation2 + $0x388] sm:$0xf0]  ;;  %v1441_v7 = vor.u32 %v1599_v2, %v1438_v4  ;;  %v1376_v9 = vld [vmem:[#allocation2 + $0x2d0] sm:$0xf]  ;;  %v1584_v11 = vld [vmem:[#allocation2 + $0x2d4] sm:$0xf] }
   0x8   :  { %v1445_v8 = vor.u32 %v1607_v6, %v1444_v5  ;;  %v1591_v10 = vld [vmem:[#allocation2 + $0x308] sm:$0xf0]  ;;  %766 = vmatpush.bf16.msra.mxu0 %v1437_v3  ;;  %v1378_v13 = vld [vmem:[#allocation2 + $0x30c] sm:$0xf0]  ;;  %v1384_v14 = vld [vmem:[#allocation2 + $0x2d8] sm:$0xf] }
   0x9   :  { %v1377_v12 = vor.u32 %v1591_v10, %v1376_v9  ;;  %v1592_v15 = vld [vmem:[#allocation2 + $0x310] sm:$0xf0]  ;;  %779 = vmatpush.bf16.msra.mxu1 %v1441_v7  ;;  %v1381_v16 = vor.u32 %v1584_v11, %v1378_v13  ;;  %v1316_v18 = vld [vmem:[#allocation2 + $0x258] sm:$0xf]  ;;  %v1569_v20 = vld [vmem:[#allocation2 + $0x25c] sm:$0xf] }
   0xa   :  { %792 = vmatpush.bf16.msra.mxu2 %v1445_v8  ;;  %v1385_v17 = vor.u32 %v1592_v15, %v1384_v14  ;;  %v1576_v19 = vld [vmem:[#allocation2 + $0x290] sm:$0xf0]  ;;  %v1318_v21 = vld [vmem:[#allocation2 + $0x294] sm:$0xf0]  ;;  %v1324_v22 = vld [vmem:[#allocation2 + $0x260] sm:$0xf] }
   0xb   :  { %v1577_v23 = vld [vmem:[#allocation2 + $0x298] sm:$0xf0]  ;;  %v1600_v24 = vld [vmem:[#allocation2 + $0x354] sm:$0xf]  ;;  %v1446_v25 = vld [vmem:[#allocation2 + $0x38c] sm:$0xf0]  ;;  %v1317_v26 = vor.u32 %v1576_v19, %v1316_v18  ;;  %v1321_v30 = vor.u32 %v1569_v20, %v1318_v21 }
   0xc   :  { %767 = vmatpush.bf16.msra.mxu0 %v1377_v12  ;;  %v1449_v27 = vor.u32 %v1600_v24, %v1446_v25  ;;  %v1256_v28 = vld [vmem:[#allocation2 + $0x1e0] sm:$0xf]  ;;  %v1561_v29 = vld [vmem:[#allocation2 + $0x218] sm:$0xf0]  ;;  %v1325_v31 = vor.u32 %v1577_v23, %v1324_v22  ;;  %v1554_v32 = vld [vmem:[#allocation2 + $0x1e4] sm:$0xf] }
   0xd   :  { %780 = vmatpush.bf16.msra.mxu1 %v1381_v16  ;;  %v1258_v33 = vld [vmem:[#allocation2 + $0x21c] sm:$0xf0]  ;;  %v1585_v34 = vld [vmem:[#allocation2 + $0x2dc] sm:$0xf]  ;;  %v1264_v35 = vld [vmem:[#allocation2 + $0x1e8] sm:$0xf]  ;;  %v1257_v39 = vor.u32 %v1561_v29, %v1256_v28 }
   0xe   :  { %793 = vmatpush.bf16.msra.mxu2 %v1385_v17  ;;  %805 = vmatpush.bf16.msra.mxu3 %v1449_v27  ;;  %v1562_v36 = vld [vmem:[#allocation2 + $0x220] sm:$0xf0]  ;;  %v1386_v37 = vld [vmem:[#allocation2 + $0x314] sm:$0xf0]  ;;  %v1326_v41 = vld [vmem:[#allocation2 + $0x29c] sm:$0xf0]  ;;  %v1261_v42 = vor.u32 %v1554_v32, %v1258_v33 }
   0xf   :  { %v1389_v38 = vor.u32 %v1585_v34, %v1386_v37  ;;  %v1570_v40 = vld [vmem:[#allocation2 + $0x264] sm:$0xf]  ;;  %v1265_v43 = vor.u32 %v1562_v36, %v1264_v35  ;;  %v1196_v44 = vld [vmem:[#allocation2 + $0x168] sm:$0xf]  ;;  %v1539_v46 = vld [vmem:[#allocation2 + $0x16c] sm:$0xf] }
  0x10   :  { %768 = vmatpush.bf16.msra.mxu0 %v1317_v26  ;;  %v1546_v45 = vld [vmem:[#allocation2 + $0x1a0] sm:$0xf0]  ;;  %v1198_v47 = vld [vmem:[#allocation2 + $0x1a4] sm:$0xf0]  ;;  %v1204_v48 = vld [vmem:[#allocation2 + $0x170] sm:$0xf]  ;;  %v1329_v50 = vor.u32 %v1570_v40, %v1326_v41 }
  0x11   :  { %781 = vmatpush.bf16.msra.mxu1 %v1321_v30  ;;  %v1547_v49 = vld [vmem:[#allocation2 + $0x1a8] sm:$0xf0]  ;;  %v1266_v52 = vld [vmem:[#allocation2 + $0x224] sm:$0xf0]  ;;  %v1197_v53 = vor.u32 %v1546_v45, %v1196_v44  ;;  %v1201_v54 = vor.u32 %v1539_v46, %v1198_v47  ;;  %v1136_v56 = vld [vmem:[#allocation2 + $0xf0] sm:$0xf] }
  0x12   :  { %794 = vmatpush.bf16.msra.mxu2 %v1325_v31  ;;  %806 = vmatpush.bf16.msra.mxu3 %v1389_v38  ;;  %v1555_v51 = vld [vmem:[#allocation2 + $0x1ec] sm:$0xf]  ;;  %v1205_v55 = vor.u32 %v1547_v49, %v1204_v48  ;;  %v1524_v58 = vld [vmem:[#allocation2 + $0xf4] sm:$0xf]  ;;  %v1138_v59 = vld [vmem:[#allocation2 + $0x12c] sm:$0xf0] }
  0x13   :  { %v1531_v57 = vld [vmem:[#allocation2 + $0x128] sm:$0xf0]  ;;  %v1144_v60 = vld [vmem:[#allocation2 + $0xf8] sm:$0xf]  ;;  %v1532_v61 = vld [vmem:[#allocation2 + $0x130] sm:$0xf0]  ;;  %v1269_v62 = vor.u32 %v1555_v51, %v1266_v52  ;;  %v1141_v2 = vor.u32 %v1524_v58, %v1138_v59 }
  0x14   :  { %769 = vmatpush.bf16.msra.mxu0 %v1257_v39  ;;  %v1540_v63 = vld [vmem:[#allocation2 + $0x174] sm:$0xf]  ;;  %v1206_v0 = vld [vmem:[#allocation2 + $0x1ac] sm:$0xf0]  ;;  %v1137_v1 = vor.u32 %v1531_v57, %v1136_v56  ;;  %v1145_v3 = vor.u32 %v1532_v61, %v1144_v60  ;;  %v1076_v4 = vld [vmem:[#allocation2 + $0x78] sm:$0xf] }
  0x15   :  { %782 = vmatpush.bf16.msra.mxu1 %v1261_v42  ;;  %v1516_v5 = vld [vmem:[#allocation2 + $0xb0] sm:$0xf0]  ;;  %v1509_v6 = vld [vmem:[#allocation2 + $0x7c] sm:$0xf]  ;;  %v1078_v7 = vld [vmem:[#allocation2 + $0xb4] sm:$0xf0]  ;;  %v1209_v10 = vor.u32 %v1540_v63, %v1206_v0 }
  0x16   :  { %795 = vmatpush.bf16.msra.mxu2 %v1265_v43  ;;  %807 = vmatpush.bf16.msra.mxu3 %v1329_v50  ;;  %v1084_v8 = vld [vmem:[#allocation2 + $0x80] sm:$0xf]  ;;  %v1517_v9 = vld [vmem:[#allocation2 + $0xb8] sm:$0xf0]  ;;  %v1146_v12 = vld [vmem:[#allocation2 + $0x134] sm:$0xf0]  ;;  %v1077_v13 = vor.u32 %v1516_v5, %v1076_v4  ;;  %v1081_v16 = vor.u32 %v1509_v6, %v1078_v7 }
  0x17   :  { %v1525_v11 = vld [vmem:[#allocation2 + $0xfc] sm:$0xf]  ;;  %v1016_v14 = vld [vmem:[#allocation2] sm:$0xf]  ;;  %v1085_v17 = vor.u32 %v1517_v9, %v1084_v8  ;;  %v1494_v18 = vld [vmem:[#allocation2 + $0x4] sm:$0xf] }
  0x18   :  { %770 = vmatpush.bf16.msra.mxu0 %v1197_v53  ;;  %v1501_v15 = vld [vmem:[#allocation2 + $0x38] sm:$0xf0]  ;;  %v1018_v19 = vld [vmem:[#allocation2 + $0x3c] sm:$0xf0]  ;;  %v1024_v20 = vld [vmem:[#allocation2 + $0x8] sm:$0xf]  ;;  %v1149_v24 = vor.u32 %v1525_v11, %v1146_v12 }
  0x19   :  { %783 = vmatpush.bf16.msra.mxu1 %v1201_v54  ;;  %v1502_v21 = vld [vmem:[#allocation2 + $0x40] sm:$0xf0]  ;;  %v1452_v22 = vld [vmem:[#allocation2 + $0x358] sm:$0xf]  ;;  %v1608_v23 = vld [vmem:[#allocation2 + $0x390] sm:$0xf0]  ;;  %v1017_v28 = vor.u32 %v1501_v15, %v1016_v14  ;;  %v1021_v32 = vor.u32 %v1494_v18, %v1018_v19 }
  0x1a   :  { %796 = vmatpush.bf16.msra.mxu2 %v1205_v55  ;;  %808 = vmatpush.bf16.msra.mxu3 %v1269_v62  ;;  %v1601_v25 = vld [vmem:[#allocation2 + $0x35c] sm:$0xf]  ;;  %v1454_v26 = vld [vmem:[#allocation2 + $0x394] sm:$0xf0]  ;;  %v1460_v27 = vld [vmem:[#allocation2 + $0x360] sm:$0xf]  ;;  %v1025_v33 = vor.u32 %v1502_v21, %v1024_v20  ;;  %v1453_v34 = vor.u32 %v1608_v23, %v1452_v22 }
  0x1b   :  { %v1609_v29 = vld [vmem:[#allocation2 + $0x398] sm:$0xf0]  ;;  %v1510_v30 = vld [vmem:[#allocation2 + $0x84] sm:$0xf]  ;;  %v1086_v31 = vld [vmem:[#allocation2 + $0xbc] sm:$0xf0]  ;;  %v1457_v35 = vor.u32 %v1601_v25, %v1454_v26 }
  0x1c   :  { %771 = vmatpush.bf16.msra.mxu0 %v1137_v1  ;;  %v1392_v36 = vld [vmem:[#allocation2 + $0x2e0] sm:$0xf]  ;;  %v1593_v37 = vld [vmem:[#allocation2 + $0x318] sm:$0xf0]  ;;  %v1461_v38 = vor.u32 %v1609_v29, %v1460_v27  ;;  %v1586_v39 = vld [vmem:[#allocation2 + $0x2e4] sm:$0xf]  ;;  %v1089_v42 = vor.u32 %v1510_v30, %v1086_v31 }
  0x1d   :  { %784 = vmatpush.bf16.msra.mxu1 %v1141_v2  ;;  %v1394_v40 = vld [vmem:[#allocation2 + $0x31c] sm:$0xf0]  ;;  %v1400_v41 = vld [vmem:[#allocation2 + $0x2e8] sm:$0xf]  ;;  %v1594_v43 = vld [vmem:[#allocation2 + $0x320] sm:$0xf0]  ;;  %v1393_v48 = vor.u32 %v1593_v37, %v1392_v36 }
  0x1e   :  { %797 = vmatpush.bf16.msra.mxu2 %v1145_v3  ;;  %809 = vmatpush.bf16.msra.mxu3 %v1209_v10  ;;  %v1495_v44 = vld [vmem:[#allocation2 + $0xc] sm:$0xf]  ;;  %v1026_v45 = vld [vmem:[#allocation2 + $0x44] sm:$0xf0]  ;;  %v1602_v46 = vld [vmem:[#allocation2 + $0x364] sm:$0xf]  ;;  %v1397_v49 = vor.u32 %v1586_v39, %v1394_v40  ;;  %v1401_v51 = vor.u32 %v1594_v43, %v1400_v41 }
  0x1f   :  { %v1462_v47 = vld [vmem:[#allocation2 + $0x39c] sm:$0xf0]  ;;  %v1332_v50 = vld [vmem:[#allocation2 + $0x268] sm:$0xf]  ;;  %v1578_v52 = vld [vmem:[#allocation2 + $0x2a0] sm:$0xf0]  ;;  %v1029_v55 = vor.u32 %v1495_v44, %v1026_v45 }
  0x20   :  { %772 = vmatpush.bf16.msra.mxu0 %v1077_v13  ;;  %v1571_v53 = vld [vmem:[#allocation2 + $0x26c] sm:$0xf]  ;;  %v1334_v54 = vld [vmem:[#allocation2 + $0x2a4] sm:$0xf0]  ;;  %v1340_v56 = vld [vmem:[#allocation2 + $0x270] sm:$0xf]  ;;  %v1465_v58 = vor.u32 %v1602_v46, %v1462_v47  ;;  %v1333_v63 = vor.u32 %v1578_v52, %v1332_v50 }
  0x21   :  { %785 = vmatpush.bf16.msra.mxu1 %v1081_v16  ;;  %v1579_v57 = vld [vmem:[#allocation2 + $0x2a8] sm:$0xf0]  ;;  %v27_v59 = vld [vmem:[%s1707_s0] sm:$0x3]  ;;  %v1402_v61 = vld [vmem:[#allocation2 + $0x324] sm:$0xf0]  ;;  %v1337_v0 = vor.u32 %v1571_v53, %v1334_v54 }
  0x22   :  { %798 = vmatpush.bf16.msra.mxu2 %v1085_v17  ;;  %810 = vmatpush.bf16.msra.mxu3 %v1149_v24  ;;  %v1587_v60 = vld [vmem:[#allocation2 + $0x2ec] sm:$0xf]  ;;  %v28_v62 = vmul.f32 14.285714, %v27_v59  ;;  %v1272_v1 = vld [vmem:[#allocation2 + $0x1f0] sm:$0xf]  ;;  %v1341_v2 = vor.u32 %v1579_v57, %v1340_v56 }
  0x23   :  { %v1563_v3 = vld [vmem:[#allocation2 + $0x228] sm:$0xf0]  ;;  %v1556_v4 = vld [vmem:[#allocation2 + $0x1f4] sm:$0xf]  ;;  %v1274_v5 = vld [vmem:[#allocation2 + $0x22c] sm:$0xf0]  ;;  %v1405_v9 = vor.u32 %v1587_v60, %v1402_v61 }
  0x24   :  { %773 = vmatpush.bf16.msra.mxu0 %v1017_v28  ;;  %v1667_v6 = vpack.c.bf16 %v28_v62, %v28_v62  ;;  %v1280_v7 = vld [vmem:[#allocation2 + $0x1f8] sm:$0xf]  ;;  %v1564_v8 = vld [vmem:[#allocation2 + $0x230] sm:$0xf0]  ;;  %v1342_v11 = vld [vmem:[#allocation2 + $0x2ac] sm:$0xf0]  ;;  %v1273_v12 = vor.u32 %v1563_v3, %v1272_v1  ;;  %v1277_v13 = vor.u32 %v1556_v4, %v1274_v5 }
  0x25   :  { %786 = vmatpush.bf16.msra.mxu1 %v1021_v32  ;;  %v1572_v10 = vld [vmem:[#allocation2 + $0x274] sm:$0xf]  ;;  %v1212_v14 = vld [vmem:[#allocation2 + $0x178] sm:$0xf]  ;;  %v1281_v15 = vor.u32 %v1564_v8, %v1280_v7  ;;  %v1541_v17 = vld [vmem:[#allocation2 + $0x17c] sm:$0xf] }
  0x26   :  { %799 = vmatpush.bf16.msra.mxu2 %v1025_v33  ;;  %811 = vmatpush.bf16.msra.mxu3 %v1089_v42  ;;  %v1548_v16 = vld [vmem:[#allocation2 + $0x1b0] sm:$0xf0]  ;;  %v1214_v18 = vld [vmem:[#allocation2 + $0x1b4] sm:$0xf0]  ;;  %v1220_v19 = vld [vmem:[#allocation2 + $0x180] sm:$0xf]  ;;  %v1345_v21 = vor.u32 %v1572_v10, %v1342_v11 }
  0x27   :  { %774 = vmatmul.bf16.vlgmr.msra.gmra.mxu0 %v1667_v6  ;;  %v1549_v20 = vld [vmem:[#allocation2 + $0x1b8] sm:$0xf0]  ;;  %v1282_v23 = vld [vmem:[#allocation2 + $0x234] sm:$0xf0]  ;;  %v1213_v24 = vor.u32 %v1548_v16, %v1212_v14  ;;  %v1217_v25 = vor.u32 %v1541_v17, %v1214_v18  ;;  %v1152_v26 = vld [vmem:[#allocation2 + $0x100] sm:$0xf] }
  0x28   :  { %818 = vmatpush.bf16.msrb.mxu0 %v1453_v34  ;;  %787 = vmatmul.bf16.vlgmr.msra.gmra.mxu1 %v1667_v6  ;;  %v1557_v22 = vld [vmem:[#allocation2 + $0x1fc] sm:$0xf]  ;;  %v1221_v27 = vor.u32 %v1549_v20, %v1220_v19  ;;  %v1526_v29 = vld [vmem:[#allocation2 + $0x104] sm:$0xf]  ;;  %v1154_v30 = vld [vmem:[#allocation2 + $0x13c] sm:$0xf0] }
  0x29   :  { %831 = vmatpush.bf16.msrb.mxu1 %v1457_v35  ;;  %800 = vmatmul.bf16.vlgmr.msra.gmra.mxu2 %v1667_v6  ;;  %v1533_v28 = vld [vmem:[#allocation2 + $0x138] sm:$0xf0]  ;;  %v1160_v31 = vld [vmem:[#allocation2 + $0x108] sm:$0xf]  ;;  %v1534_v32 = vld [vmem:[#allocation2 + $0x140] sm:$0xf0]  ;;  %v1285_v33 = vor.u32 %v1557_v22, %v1282_v23  ;;  %v1157_v37 = vor.u32 %v1526_v29, %v1154_v30 }
  0x2a   :  { %844 = vmatpush.bf16.msrb.mxu2 %v1461_v38  ;;  %812 = vmatpush.bf16.msra.mxu3 %v1029_v55  ;;  %v1542_v34 = vld [vmem:[#allocation2 + $0x184] sm:$0xf]  ;;  %v1222_v35 = vld [vmem:[#allocation2 + $0x1bc] sm:$0xf0]  ;;  %v1153_v36 = vor.u32 %v1533_v28, %v1152_v26  ;;  %v1092_v38 = vld [vmem:[#allocation2 + $0x88] sm:$0xf]  ;;  %v1161_v39 = vor.u32 %v1534_v32, %v1160_v31 }
  0x2b   :  { %v1518_v40 = vld [vmem:[#allocation2 + $0xc0] sm:$0xf0]  ;;  %v1511_v41 = vld [vmem:[#allocation2 + $0x8c] sm:$0xf]  ;;  %v1094_v42 = vld [vmem:[#allocation2 + $0xc4] sm:$0xf0]  ;;  %v1225_v45 = vor.u32 %v1542_v34, %v1222_v35 }
  0x2c   :  { %819 = vmatpush.bf16.msrb.mxu0 %v1393_v48  ;;  %v1100_v43 = vld [vmem:[#allocation2 + $0x90] sm:$0xf]  ;;  %v1519_v44 = vld [vmem:[#allocation2 + $0xc8] sm:$0xf0]  ;;  %v1162_v47 = vld [vmem:[#allocation2 + $0x144] sm:$0xf0]  ;;  %v1093_v48 = vor.u32 %v1518_v40, %v1092_v38 }
  0x2d   :  { %832 = vmatpush.bf16.msrb.mxu1 %v1397_v49  ;;  %813 = vmatmul.bf16.vlgmr.msra.gmra.mxu3 %v1667_v6  ;;  %v1527_v46 = vld [vmem:[#allocation2 + $0x10c] sm:$0xf]  ;;  %v1097_v49 = vor.u32 %v1511_v41, %v1094_v42  ;;  %v1032_v50 = vld [vmem:[#allocation2 + $0x10] sm:$0xf]  ;;  %v1496_v52 = vld [vmem:[#allocation2 + $0x14] sm:$0xf]  ;;  %v1101_v53 = vor.u32 %v1519_v44, %v1100_v43 }
  0x2e   :  { %845 = vmatpush.bf16.msrb.mxu2 %v1401_v51  ;;  %857 = vmatpush.bf16.msrb.mxu3 %v1465_v58  ;;  %v1503_v51 = vld [vmem:[#allocation2 + $0x48] sm:$0xf0]  ;;  %v1034_v54 = vld [vmem:[#allocation2 + $0x4c] sm:$0xf0]  ;;  %v1040_v55 = vld [vmem:[#allocation2 + $0x18] sm:$0xf]  ;;  %v1165_v60 = vor.u32 %v1527_v46, %v1162_v47 }
  0x2f   :  { %v1504_v56 = vld [vmem:[#allocation2 + $0x50] sm:$0xf0]  ;;  %v1468_v57 = vld [vmem:[#allocation2 + $0x368] sm:$0xf]  ;;  %v1610_v58 = vld [vmem:[#allocation2 + $0x3a0] sm:$0xf0]  ;;  %v1037_v1 = vor.u32 %v1496_v52, %v1034_v54 }
  0x30   :  { %820 = vmatpush.bf16.msrb.mxu0 %v1333_v63  ;;  %v1603_v59 = vld [vmem:[#allocation2 + $0x36c] sm:$0xf]  ;;  %v1470_v61 = vld [vmem:[#allocation2 + $0x3a4] sm:$0xf0]  ;;  %v1476_v62 = vld [vmem:[#allocation2 + $0x370] sm:$0xf]  ;;  %v1041_v4 = vor.u32 %v1504_v56, %v1040_v55  ;;  %v1469_v5 = vor.u32 %v1610_v58, %v1468_v57 }
  0x31   :  { %833 = vmatpush.bf16.msrb.mxu1 %v1337_v0  ;;  %v1611_v63 = vld [vmem:[#allocation2 + $0x3a8] sm:$0xf0]  ;;  %v1033_v0 = vor.u32 %v1503_v51, %v1032_v50  ;;  %v1102_v3 = vld [vmem:[#allocation2 + $0xcc] sm:$0xf0]  ;;  %v1473_v7 = vor.u32 %v1603_v59, %v1470_v61  ;;  %v1588_v11 = vld [vmem:[#allocation2 + $0x2f4] sm:$0xf] }
  0x32   :  { %846 = vmatpush.bf16.msrb.mxu2 %v1341_v2  ;;  %858 = vmatpush.bf16.msrb.mxu3 %v1405_v9  ;;  %v1512_v2 = vld [vmem:[#allocation2 + $0x94] sm:$0xf]  ;;  %v1477_v8 = vor.u32 %v1611_v63, %v1476_v62  ;;  %v1408_v9 = vld [vmem:[#allocation2 + $0x2f0] sm:$0xf]  ;;  %v1595_v10 = vld [vmem:[#allocation2 + $0x328] sm:$0xf0] }
  0x33   :  { %v1596_v14 = vld [vmem:[#allocation2 + $0x330] sm:$0xf0]  ;;  %v1497_v16 = vld [vmem:[#allocation2 + $0x1c] sm:$0xf]  ;;  %v1042_v17 = vld [vmem:[#allocation2 + $0x54] sm:$0xf0]  ;;  %v1409_v18 = vor.u32 %v1595_v10, %v1408_v9 }
  0x34   :  { %821 = vmatpush.bf16.msrb.mxu0 %v1273_v12  ;;  %v1410_v12 = vld [vmem:[#allocation2 + $0x32c] sm:$0xf0]  ;;  %v1604_v19 = vld [vmem:[#allocation2 + $0x374] sm:$0xf]  ;;  %v1348_v23 = vld [vmem:[#allocation2 + $0x278] sm:$0xf]  ;;  %v1045_v29 = vor.u32 %v1497_v16, %v1042_v17 }
  0x35   :  { %834 = vmatpush.bf16.msrb.mxu1 %v1277_v13  ;;  %v1416_v13 = vld [vmem:[#allocation2 + $0x2f8] sm:$0xf]  ;;  %v1478_v20 = vld [vmem:[#allocation2 + $0x3ac] sm:$0xf0]  ;;  %v1581_v28 = vld [vmem:[#allocation2 + $0x2b8] sm:$0xf0] }
  0x36   :  { %847 = vmatpush.bf16.msrb.mxu2 %v1281_v15  ;;  %859 = vmatpush.bf16.msrb.mxu3 %v1345_v21  ;;  %v1105_v15 = vor.u32 %v1512_v2, %v1102_v3  ;;  %v1413_v21 = vor.u32 %v1588_v11, %v1410_v12  ;;  %v1417_v22 = vor.u32 %v1596_v14, %v1416_v13  ;;  %v1350_v26 = vld [vmem:[#allocation2 + $0x2b4] sm:$0xf0]  ;;  %v1589_v32 = vld [vmem:[#allocation2 + $0x2fc] sm:$0xf]  ;;  %v1558_v38 = vld [vmem:[#allocation2 + $0x204] sm:$0xf] }
  0x37   :  { %v1481_v30 = vor.u32 %v1604_v19, %v1478_v20  ;;  %v1296_v40 = vld [vmem:[#allocation2 + $0x208] sm:$0xf]  ;;  %v1566_v41 = vld [vmem:[#allocation2 + $0x240] sm:$0xf0]  ;;  %v1543_v50 = vld [vmem:[#allocation2 + $0x18c] sm:$0xf] }
  0x38   :  { %822 = vmatpush.bf16.msrb.mxu0 %v1213_v24  ;;  %v1580_v24 = vld [vmem:[#allocation2 + $0x2b0] sm:$0xf0]  ;;  %v1574_v44 = vld [vmem:[#allocation2 + $0x284] sm:$0xf]  ;;  %v1297_v47 = vor.u32 %v1566_v41, %v1296_v40  ;;  %v1230_v51 = vld [vmem:[#allocation2 + $0x1c4] sm:$0xf0] }
  0x39   :  { %835 = vmatpush.bf16.msrb.mxu1 %v1217_v25  ;;  %v1573_v25 = vld [vmem:[#allocation2 + $0x27c] sm:$0xf]  ;;  %v1349_v31 = vor.u32 %v1580_v24, %v1348_v23  ;;  %v1236_v52 = vld [vmem:[#allocation2 + $0x190] sm:$0xf]  ;;  %v1559_v56 = vld [vmem:[#allocation2 + $0x20c] sm:$0xf]  ;;  %v1233_v58 = vor.u32 %v1543_v50, %v1230_v51 }
  0x3a   :  { %848 = vmatpush.bf16.msrb.mxu2 %v1221_v27  ;;  %860 = vmatpush.bf16.msrb.mxu3 %v1285_v33  ;;  %v1356_v27 = vld [vmem:[#allocation2 + $0x280] sm:$0xf]  ;;  %v1418_v33 = vld [vmem:[#allocation2 + $0x334] sm:$0xf0]  ;;  %v1353_v34 = vor.u32 %v1573_v25, %v1350_v26  ;;  %v1298_v57 = vld [vmem:[#allocation2 + $0x244] sm:$0xf0] }
  0x3b   :  { %v1357_v35 = vor.u32 %v1581_v28, %v1356_v27  ;;  %v1421_v42 = vor.u32 %v1589_v32, %v1418_v33  ;;  %v1535_v61 = vld [vmem:[#allocation2 + $0x148] sm:$0xf0]  ;;  %v1528_v62 = vld [vmem:[#allocation2 + $0x114] sm:$0xf]  ;;  %v1170_v63 = vld [vmem:[#allocation2 + $0x14c] sm:$0xf0]  ;;  %v1301_v2 = vor.u32 %v1559_v56, %v1298_v57 }
  0x3c   :  { %823 = vmatpush.bf16.msrb.mxu0 %v1153_v36  ;;  %v1288_v36 = vld [vmem:[#allocation2 + $0x200] sm:$0xf]  ;;  %v1108_v9 = vld [vmem:[#allocation2 + $0x98] sm:$0xf]  ;;  %v1520_v10 = vld [vmem:[#allocation2 + $0xd0] sm:$0xf0] }
  0x3d   :  { %836 = vmatpush.bf16.msrb.mxu1 %v1157_v37  ;;  %v1565_v37 = vld [vmem:[#allocation2 + $0x238] sm:$0xf0]  ;;  %v1110_v12 = vld [vmem:[#allocation2 + $0xd4] sm:$0xf0]  ;;  %v1116_v13 = vld [vmem:[#allocation2 + $0xa0] sm:$0xf]  ;;  %v1109_v17 = vor.u32 %v1520_v10, %v1108_v9 }
  0x3e   :  { %849 = vmatpush.bf16.msrb.mxu2 %v1161_v39  ;;  %861 = vmatpush.bf16.msrb.mxu3 %v1225_v45  ;;  %v1290_v39 = vld [vmem:[#allocation2 + $0x23c] sm:$0xf0]  ;;  %v1289_v43 = vor.u32 %v1565_v37, %v1288_v36  ;;  %v1513_v11 = vld [vmem:[#allocation2 + $0x9c] sm:$0xf]  ;;  %v1178_v20 = vld [vmem:[#allocation2 + $0x154] sm:$0xf0] }
  0x3f   :  { %v1358_v45 = vld [vmem:[#allocation2 + $0x2bc] sm:$0xf0]  ;;  %v1293_v46 = vor.u32 %v1558_v38, %v1290_v39  ;;  %v1521_v14 = vld [vmem:[#allocation2 + $0xd8] sm:$0xf0]  ;;  %v1498_v23 = vld [vmem:[#allocation2 + $0x24] sm:$0xf] }
  0x40   :  { %824 = vmatpush.bf16.msrb.mxu0 %v1093_v48  ;;  %v1228_v48 = vld [vmem:[#allocation2 + $0x188] sm:$0xf]  ;;  %v1361_v54 = vor.u32 %v1574_v44, %v1358_v45  ;;  %v1048_v16 = vld [vmem:[#allocation2 + $0x20] sm:$0xf]  ;;  %v1529_v19 = vld [vmem:[#allocation2 + $0x11c] sm:$0xf] }
  0x41   :  { %837 = vmatpush.bf16.msrb.mxu1 %v1097_v49  ;;  %v1550_v49 = vld [vmem:[#allocation2 + $0x1c0] sm:$0xf0]  ;;  %v1050_v24 = vld [vmem:[#allocation2 + $0x5c] sm:$0xf0]  ;;  %v1056_v25 = vld [vmem:[#allocation2 + $0x28] sm:$0xf]  ;;  %v1181_v32 = vor.u32 %v1529_v19, %v1178_v20 }
  0x42   :  { %850 = vmatpush.bf16.msrb.mxu2 %v1101_v53  ;;  %862 = vmatpush.bf16.msrb.mxu3 %v1165_v60  ;;  %v1551_v53 = vld [vmem:[#allocation2 + $0x1c8] sm:$0xf0]  ;;  %v1229_v55 = vor.u32 %v1550_v49, %v1228_v48  ;;  %v1168_v60 = vld [vmem:[#allocation2 + $0x110] sm:$0xf]  ;;  %v1506_v26 = vld [vmem:[#allocation2 + $0x60] sm:$0xf0]  ;;  %v1053_v37 = vor.u32 %v1498_v23, %v1050_v24 }
  0x43   :  { %v1237_v59 = vor.u32 %v1551_v53, %v1236_v52  ;;  %v1169_v3 = vor.u32 %v1535_v61, %v1168_v60  ;;  %v1484_v27 = vld [vmem:[#allocation2 + $0x378] sm:$0xf]  ;;  %v1612_v28 = vld [vmem:[#allocation2 + $0x3b0] sm:$0xf0]  ;;  %v1118_v36 = vld [vmem:[#allocation2 + $0xdc] sm:$0xf0]  ;;  %v1057_v38 = vor.u32 %v1506_v26, %v1056_v25 }
  0x44   :  { %825 = vmatpush.bf16.msrb.mxu0 %v1033_v0  ;;  %v1176_v0 = vld [vmem:[#allocation2 + $0x118] sm:$0xf]  ;;  %v1485_v39 = vor.u32 %v1612_v28, %v1484_v27  ;;  %v1424_v41 = vld [vmem:[#allocation2 + $0x300] sm:$0xf]  ;;  %v1590_v44 = vld [vmem:[#allocation2 + $0x304] sm:$0xf] }
  0x45   :  { %838 = vmatpush.bf16.msrb.mxu1 %v1037_v1  ;;  %v1536_v1 = vld [vmem:[#allocation2 + $0x150] sm:$0xf0]  ;;  %v1426_v45 = vld [vmem:[#allocation2 + $0x33c] sm:$0xf0]  ;;  %v1598_v48 = vld [vmem:[#allocation2 + $0x340] sm:$0xf0] }
  0x46   :  { %851 = vmatpush.bf16.msrb.mxu2 %v1041_v4  ;;  %863 = vmatpush.bf16.msrb.mxu3 %v1105_v15  ;;  %v1544_v4 = vld [vmem:[#allocation2 + $0x194] sm:$0xf]  ;;  %v1499_v49 = vld [vmem:[#allocation2 + $0x2c] sm:$0xf]  ;;  %v1058_v50 = vld [vmem:[#allocation2 + $0x64] sm:$0xf0]  ;;  %v1429_v52 = vor.u32 %v1590_v44, %v1426_v45 }
  0x47   :  { %826 = vmatmul.bf16.vlgmr.msrb.gmra.mxu0 %v1667_v6  ;;  %v1364_v53 = vld [vmem:[#allocation2 + $0x288] sm:$0xf]  ;;  %v1575_v56 = vld [vmem:[#allocation2 + $0x28c] sm:$0xf]  ;;  %v1244_v9 = vld [vmem:[#allocation2 + $0x198] sm:$0xf] }
  0x48   :  { %870 = vmatpush.bf16.msra.mxu0 %v1469_v5  ;;  %839 = vmatmul.bf16.vlgmr.msrb.gmra.mxu1 %v1667_v6  ;;  %v1238_v5 = vld [vmem:[#allocation2 + $0x1cc] sm:$0xf0]  ;;  %v1366_v57 = vld [vmem:[#allocation2 + $0x2c4] sm:$0xf0]  ;;  %v1583_v60 = vld [vmem:[#allocation2 + $0x2c8] sm:$0xf0] }
  0x49   :  { %883 = vmatpush.bf16.msra.mxu1 %v1473_v7  ;;  %852 = vmatmul.bf16.vlgmr.msrb.gmra.mxu2 %v1667_v6  ;;  %v1173_v7 = vor.u32 %v1528_v62, %v1170_v63  ;;  %v1241_v15 = vor.u32 %v1544_v4, %v1238_v5  ;;  %v1369_v62 = vor.u32 %v1575_v56, %v1366_v57  ;;  %v1304_v63 = vld [vmem:[#allocation2 + $0x210] sm:$0xf]  ;;  %v1312_v4 = vld [vmem:[#allocation2 + $0x218] sm:$0xf]  ;;  %v1568_v5 = vld [vmem:[#allocation2 + $0x250] sm:$0xf0] }
  0x4a   :  { %896 = vmatpush.bf16.msra.mxu2 %v1477_v8  ;;  %864 = vmatpush.bf16.msrb.mxu3 %v1045_v29  ;;  %v1177_v8 = vor.u32 %v1536_v1, %v1176_v0  ;;  %v1605_v29 = vld [vmem:[#allocation2 + $0x37c] sm:$0xf]  ;;  %v1567_v1 = vld [vmem:[#allocation2 + $0x248] sm:$0xf0]  ;;  %v1313_v10 = vor.u32 %v1568_v5, %v1312_v4  ;;  %v1192_v23 = vld [vmem:[#allocation2 + $0x128] sm:$0xf] }
  0x4b   :  { %v1537_v20 = vld [vmem:[#allocation2 + $0x158] sm:$0xf0]  ;;  %v1538_v24 = vld [vmem:[#allocation2 + $0x160] sm:$0xf0]  ;;  %v1124_v27 = vld [vmem:[#allocation2 + $0xa8] sm:$0xf] }
  0x4c   :  { %871 = vmatpush.bf16.msra.mxu0 %v1409_v18  ;;  %v1505_v18 = vld [vmem:[#allocation2 + $0x58] sm:$0xf0]  ;;  %v1193_v28 = vor.u32 %v1538_v24, %v1192_v23  ;;  %vm987_vm0 = vcmask 1041408   ;;  %vm989_vm1 = vcmask 1045508   ;;  %vm991_vm2 = vcmask 1043456  }
  0x4d   :  { %884 = vmatpush.bf16.msra.mxu1 %v1413_v21  ;;  %865 = vmatmul.bf16.vlgmr.msrb.gmra.mxu3 %v1667_v6  ;;  %v1113_v21 = vor.u32 %v1513_v11, %v1110_v12  ;;  %v1049_v33 = vor.u32 %v1505_v18, %v1048_v16  ;;  %v1552_v11 = vld [vmem:[#allocation2 + $0x1d0] sm:$0xf0]  ;;  %v1545_v12 = vld [vmem:[#allocation2 + $0x19c] sm:$0xf]  ;;  %v1184_v18 = vld [vmem:[#allocation2 + $0x120] sm:$0xf] }
  0x4e   :  { %897 = vmatpush.bf16.msra.mxu2 %v1417_v22  ;;  %909 = vmatpush.bf16.msra.mxu3 %v1481_v30  ;;  %v1117_v22 = vor.u32 %v1521_v14, %v1116_v13  ;;  %v1486_v30 = vld [vmem:[#allocation2 + $0x3b4] sm:$0xf0]  ;;  %v1252_v14 = vld [vmem:[#allocation2 + $0x1a0] sm:$0xf]  ;;  %v1245_v16 = vor.u32 %v1552_v11, %v1244_v9  ;;  %v1185_v25 = vor.u32 %v1537_v20, %v1184_v18 }
  0x4f   :  { %v1489_v40 = vor.u32 %v1605_v29, %v1486_v30  ;;  %v1246_v13 = vld [vmem:[#allocation2 + $0x1d4] sm:$0xf0]  ;;  %v1522_v29 = vld [vmem:[#allocation2 + $0xe0] sm:$0xf0]  ;;  %v1515_v30 = vld [vmem:[#allocation2 + $0xac] sm:$0xf] }
  0x50   :  { %872 = vmatpush.bf16.msra.mxu0 %v1349_v31  ;;  %v1492_v31 = vld [vmem:[#allocation2 + $0x380] sm:$0xf] }
  0x51   :  { %885 = vmatpush.bf16.msra.mxu1 %v1353_v34  ;;  %v1613_v34 = vld [vmem:[#allocation2 + $0x3b8] sm:$0xf0] }
  0x52   :  { %898 = vmatpush.bf16.msra.mxu2 %v1357_v35  ;;  %910 = vmatpush.bf16.msra.mxu3 %v1421_v42  ;;  %v1514_v35 = vld [vmem:[#allocation2 + $0xa4] sm:$0xf]  ;;  %v1597_v42 = vld [vmem:[#allocation2 + $0x338] sm:$0xf0] }
  0x53   :  { %v1425_v51 = vor.u32 %v1597_v42, %v1424_v41  ;;  %v1072_v41 = vld [vmem:[#allocation2 + $0x38] sm:$0xf]  ;;  %v1508_v42 = vld [vmem:[#allocation2 + $0x70] sm:$0xf0] }
  0x54   :  { %873 = vmatpush.bf16.msra.mxu0 %v1289_v43  ;;  %v1493_v43 = vor.u32 %v1613_v34, %v1492_v31  ;;  %v1126_v31 = vld [vmem:[#allocation2 + $0xe4] sm:$0xf0]  ;;  %v1125_v34 = vor.u32 %v1522_v29, %v1124_v27  ;;  %v1073_v45 = vor.u32 %v1508_v42, %v1072_v41 }
  0x55   :  { %886 = vmatpush.bf16.msra.mxu1 %v1293_v46  ;;  %v1432_v46 = vld [vmem:[#allocation2 + $0x308] sm:$0xf] }
  0x56   :  { %899 = vmatpush.bf16.msra.mxu2 %v1297_v47  ;;  %911 = vmatpush.bf16.msra.mxu3 %v1361_v54  ;;  %v1121_v47 = vor.u32 %v1514_v35, %v1118_v36  ;;  %v1433_v54 = vor.u32 %v1598_v48, %v1432_v46  ;;  %v1129_v35 = vor.u32 %v1515_v30, %v1126_v31  ;;  %v1064_v36 = vld [vmem:[#allocation2 + $0x30] sm:$0xf] }
  0x58   :  { %874 = vmatpush.bf16.msra.mxu0 %v1229_v55  ;;  %v1582_v55 = vld [vmem:[#allocation2 + $0x2c0] sm:$0xf0] }
  0x59   :  { %887 = vmatpush.bf16.msra.mxu1 %v1233_v58  ;;  %v1061_v58 = vor.u32 %v1499_v49, %v1058_v50  ;;  %v1365_v61 = vor.u32 %v1582_v55, %v1364_v53 }
  0x5a   :  { %900 = vmatpush.bf16.msra.mxu2 %v1237_v59  ;;  %912 = vmatpush.bf16.msra.mxu3 %v1301_v2  ;;  %v1372_v59 = vld [vmem:[#allocation2 + $0x290] sm:$0xf]  ;;  %v1560_v2 = vld [vmem:[#allocation2 + $0x214] sm:$0xf] }
  0x5b   :  { %v1373_v0 = vor.u32 %v1583_v60, %v1372_v59 }
  0x5c   :  { %875 = vmatpush.bf16.msra.mxu0 %v1169_v3  ;;  %v1306_v3 = vld [vmem:[#allocation2 + $0x24c] sm:$0xf0] }
  0x5d   :  { %888 = vmatpush.bf16.msra.mxu1 %v1173_v7  ;;  %v1305_v7 = vor.u32 %v1567_v1, %v1304_v63 }
  0x5e   :  { %901 = vmatpush.bf16.msra.mxu2 %v1177_v8  ;;  %913 = vmatpush.bf16.msra.mxu3 %v1241_v15  ;;  %v1309_v8 = vor.u32 %v1560_v2, %v1306_v3  ;;  %v1553_v15 = vld [vmem:[#allocation2 + $0x1d8] sm:$0xf0] }
  0x5f   :  { %v1253_v19 = vor.u32 %v1553_v15, %v1252_v14 }
  0x60   :  { %876 = vmatpush.bf16.msra.mxu0 %v1109_v17  ;;  %v1249_v17 = vor.u32 %v1545_v12, %v1246_v13 }
  0x61   :  { %889 = vmatpush.bf16.msra.mxu1 %v1113_v21  ;;  %v1530_v21 = vld [vmem:[#allocation2 + $0x124] sm:$0xf] }
  0x62   :  { %902 = vmatpush.bf16.msra.mxu2 %v1117_v22  ;;  %914 = vmatpush.bf16.msra.mxu3 %v1181_v32  ;;  %v1186_v22 = vld [vmem:[#allocation2 + $0x15c] sm:$0xf0]  ;;  %v1132_v32 = vld [vmem:[#allocation2 + $0xb0] sm:$0xf] }
  0x63   :  { %v1189_v26 = vor.u32 %v1530_v21, %v1186_v22 }
  0x64   :  { %877 = vmatpush.bf16.msra.mxu0 %v1049_v33  ;;  %v1523_v33 = vld [vmem:[#allocation2 + $0xe8] sm:$0xf0] }
  0x65   :  { %890 = vmatpush.bf16.msra.mxu1 %v1053_v37  ;;  %v1133_v37 = vor.u32 %v1523_v33, %v1132_v32 }
  0x66   :  { %903 = vmatpush.bf16.msra.mxu2 %v1057_v38  ;;  %915 = vmatpush.bf16.msra.mxu3 %v1121_v47  ;;  %v1507_v38 = vld [vmem:[#allocation2 + $0x68] sm:$0xf0] }
  0x67   :  { %878 = vmatmul.bf16.vlgmr.msra.gmra.mxu0 %v1667_v6 }
  0x68   :  { %922 = vmatpush.bf16.msrb.mxu0 %v1485_v39  ;;  %891 = vmatmul.bf16.vlgmr.msra.gmra.mxu1 %v1667_v6  ;;  %v1500_v39 = vld [vmem:[#allocation2 + $0x34] sm:$0xf] }
  0x69   :  { %935 = vmatpush.bf16.msrb.mxu1 %v1489_v40  ;;  %904 = vmatmul.bf16.vlgmr.msra.gmra.mxu2 %v1667_v6  ;;  %v1066_v40 = vld [vmem:[#allocation2 + $0x6c] sm:$0xf0] }
  0x6a   :  { %948 = vmatpush.bf16.msrb.mxu2 %v1493_v43  ;;  %916 = vmatpush.bf16.msra.mxu3 %v1061_v58  ;;  %v1065_v43 = vor.u32 %v1507_v38, %v1064_v36  ;;  %v1069_v44 = vor.u32 %v1500_v39, %v1066_v40 }
  0x6c   :  { %923 = vmatpush.bf16.msrb.mxu0 %v1425_v51 }
  0x6d   :  { %936 = vmatpush.bf16.msrb.mxu1 %v1429_v52  ;;  %917 = vmatmul.bf16.vlgmr.msra.gmra.mxu3 %v1667_v6 }
  0x6e   :  { %949 = vmatpush.bf16.msrb.mxu2 %v1433_v54 }
  0x70   :  { %924 = vmatpush.bf16.msrb.mxu0 %v1365_v61 }
  0x71   :  { %937 = vmatpush.bf16.msrb.mxu1 %v1369_v62 }
  0x72   :  { %950 = vmatpush.bf16.msrb.mxu2 %v1373_v0 }
  0x74   :  { %925 = vmatpush.bf16.msrb.mxu0 %v1305_v7 }
  0x75   :  { %938 = vmatpush.bf16.msrb.mxu1 %v1309_v8 }
  0x76   :  { %951 = vmatpush.bf16.msrb.mxu2 %v1313_v10 }
  0x78   :  { %926 = vmatpush.bf16.msrb.mxu0 %v1245_v16 }
  0x79   :  { %939 = vmatpush.bf16.msrb.mxu1 %v1249_v17 }
  0x7a   :  { %952 = vmatpush.bf16.msrb.mxu2 %v1253_v19 }
  0x7c   :  { %927 = vmatpush.bf16.msrb.mxu0 %v1185_v25 }
  0x7d   :  { %940 = vmatpush.bf16.msrb.mxu1 %v1189_v26 }
  0x7e   :  { %953 = vmatpush.bf16.msrb.mxu2 %v1193_v28 }
  0x80   :  { %928 = vmatpush.bf16.msrb.mxu0 %v1125_v34 }
  0x81   :  { %941 = vmatpush.bf16.msrb.mxu1 %v1129_v35 }
  0x82   :  { %954 = vmatpush.bf16.msrb.mxu2 %v1133_v37 }
  0x84   :  { %929 = vmatpush.bf16.msrb.mxu0 %v1065_v43 }
  0x85   :  { %942 = vmatpush.bf16.msrb.mxu1 %v1069_v44 }
  0x86   :  { %955 = vmatpush.bf16.msrb.mxu2 %v1073_v45 }
  0x87   :  { %930 = vmatmul.bf16.vlgmr.msrb.gmra.mxu0 %v1667_v6 }
  0x88   :  { %943 = vmatmul.bf16.vlgmr.msrb.gmra.mxu1 %v1667_v6 }
  0x89   :  { %956 = vmatmul.bf16.vlgmr.msrb.gmra.mxu2 %v1667_v6 }
  0xa4   :  { %v775_v46 = vpop.f32.mrf.mxu0 }
  0xa5   :  { %v788_v47 = vpop.f32.mrf.mxu1 }
  0xa6   :  { %v976_v49 = vrot.slane %v788_v47, 6 }
  0xa8   :  { %v988_v54 = vsel %vm987_vm0, %v775_v46, %v976_v49 }
  0xac   :  { %v801_v48 = vpop.f32.mrf.mxu2  ;;  %v777_v50 = vpop.f32.mrf.mxu0 }
  0xad   :  { %v977_v51 = vrot.slane %v801_v48, 4  ;;  %v790_v53 = vpop.f32.mrf.mxu1 }
  0xb0   :  { %v814_v52 = vpop.f32.mrf.mxu3 }
  0xb1   :  { %v978_v55 = vrot.slane %v814_v52, 2 }
  0xb3   :  { %v990_v56 = vsel %vm989_vm1, %v977_v51, %v978_v55 }
  0xb4   :  { %v992_v57 = vsel %vm991_vm2, %v988_v54, %v990_v56  ;;  %v803_v58 = vpop.f32.mrf.mxu2 }
  0xb5   :  { %1005 = vst [vmem:[%s1709_s2] sm:$0xff] %v992_v57 }
  0xb8   :  { %v816_v6 = vpop.f32.mrf.mxu3 }
  0xc4   :  { %v827_v59 = vpop.f32.mrf.mxu0 }
  0xc5   :  { %v840_v60 = vpop.f32.mrf.mxu1 }
  0xc6   :  { %v979_v0 = vrot.slane %v840_v60, 6 }
  0xc8   :  { %v993_v3 = vsel %vm987_vm0, %v827_v59, %v979_v0 }
  0xcc   :  { %v853_v61 = vpop.f32.mrf.mxu2  ;;  %v829_v62 = vpop.f32.mrf.mxu0 }
  0xcd   :  { %v842_v63 = vpop.f32.mrf.mxu1  ;;  %v980_v1 = vrot.slane %v853_v61, 4 }
  0xd0   :  { %v866_v2 = vpop.f32.mrf.mxu3 }
  0xd1   :  { %v981_v4 = vrot.slane %v866_v2, 2 }
  0xd3   :  { %v994_v7 = vsel %vm989_vm1, %v980_v1, %v981_v4 }
  0xd4   :  { %v855_v5 = vpop.f32.mrf.mxu2  ;;  %v995_v8 = vsel %vm991_vm2, %v993_v3, %v994_v7 }
  0xd5   :  { %1006 = vst [vmem:[%s1709_s2 + $0x8] sm:$0xff] %v995_v8 }
  0xd8   :  { %v868_v9 = vpop.f32.mrf.mxu3 }
  0xe4   :  { %v879_v10 = vpop.f32.mrf.mxu0 }
  0xe5   :  { %v892_v11 = vpop.f32.mrf.mxu1 }
  0xe6   :  { %v982_v15 = vrot.slane %v892_v11, 6 }
  0xe8   :  { %v996_v18 = vsel %vm987_vm0, %v879_v10, %v982_v15 }
  0xec   :  { %v905_v12 = vpop.f32.mrf.mxu2  ;;  %v881_v13 = vpop.f32.mrf.mxu0 }
  0xed   :  { %v894_v14 = vpop.f32.mrf.mxu1  ;;  %v983_v16 = vrot.slane %v905_v12, 4 }
  0xf0   :  { %v918_v17 = vpop.f32.mrf.mxu3 }
  0xf1   :  { %v984_v19 = vrot.slane %v918_v17, 2 }
  0xf3   :  { %v997_v21 = vsel %vm989_vm1, %v983_v16, %v984_v19 }
  0xf4   :  { %v907_v20 = vpop.f32.mrf.mxu2  ;;  %v998_v22 = vsel %vm991_vm2, %v996_v18, %v997_v21 }
  0xf5   :  { %1007 = vst [vmem:[%s1709_s2 + $0x10] sm:$0xff] %v998_v22 }
  0xf8   :  { %v920_v23 = vpop.f32.mrf.mxu3 }
 0x104   :  { %v931_v24 = vpop.f32.mrf.mxu0 }
 0x105   :  { %v944_v25 = vpop.f32.mrf.mxu1 }
 0x106   :  { %v985_v26 = vrot.slane %v944_v25, 6 }
 0x108   :  { %v999_v27 = vsel %vm987_vm0, %v931_v24, %v985_v26 }
 0x10c   :  { %v957_v28 = vpop.f32.mrf.mxu2  ;;  %v933_v30 = vpop.f32.mrf.mxu0 }
 0x10d   :  { %v986_v29 = vrot.slane %v957_v28, 4  ;;  %v946_v31 = vpop.f32.mrf.mxu1 }
 0x10f   :  { %v1000_v32 = vsel %vm991_vm2, %v999_v27, %v986_v29 }
 0x110   :  { %1008 = vst [vmem:[%s1709_s2 + $0x18] sm:$0x3f] %v1000_v32 }
 0x114   :  { %v959_v33 = vpop.f32.mrf.mxu2 }
 0x115   :  { %1013 = vsyncpa [#allocation3], 1 }

</bundles_post_ra>
